<compile_context>
chip_gen: v7x
topology: tpu7x:2x2x1
jax: 0.10.0
libtpu: 0.0.40
codegen_flags: <defaults>
</compile_context>

<pallas_src>
import functools
import math

import numpy as np
import jax
import jax.numpy as jnp
from jax.experimental import pallas as pl
from jax.experimental.pallas import tpu as pltpu


def _pe_kernel(ab_ref, out_ref):
    """out[r, c] = sin(r_global * A[c] + B[c]) for one (block_rows, cols) tile.

    ab_ref is a (2, cols) tile: row 0 = A (per-lane angular rate), row 1 = B
    (per-lane phase, with cos(x) == sin(x + pi/2) folded in).
    """
    rows, cols = out_ref.shape
    base = pl.program_id(0) * rows                                  # exact int32
    r = (jax.lax.broadcasted_iota(jnp.int32, (rows, cols), 0) + base
         ).astype(jnp.float32)
    a = ab_ref[0:1, :]                                              # (1, cols)
    b = ab_ref[1:2, :]                                              # (1, cols)
    out_ref[...] = jnp.sin(r * a + b).astype(out_ref.dtype)


def _plan(dim: int, max_pos: int):
    """Pick the output slab layout: (slab_rows, cols, per). Always lane-dense."""
    if dim % 128 == 0:
        return max_pos, dim, 1                  # natural layout, already lane-dense
    if dim < 128 and 128 % dim == 0 and max_pos % (128 // dim) == 0:
        per = 128 // dim                        # positions packed per 128-lane row
        return max_pos // per, 128, per
    # Non-divisor dims (48, 96, 160, ...): pad lanes to a multiple of 128 so the
    # stores stay unmasked full-width; wrapper slices [:, :dim] once at build.
    cols = ((dim + 127) // 128) * 128
    return max_pos, cols, 1


def _coefficients(dim: int, cols: int, per: int):
    """Bake column-only constants A, B (float64 math, single final f32 round)."""
    c = np.arange(cols)
    valid = c < per * dim                      # pad lanes (if any) get A = B = 0
    feat = np.where(valid, c % dim, 0)         # interleaved feature index
    k = feat // 2                              # frequency index
    inv_freq = np.exp(-(k.astype(np.float64) / dim) * math.log(10000.0))  # 1/freq
    phase = (feat % 2).astype(np.float64) * (np.pi / 2.0)  # cos(x) = sin(x + pi/2)
    coff = np.where(valid, c // dim, 0).astype(np.float64)  # pos offset in slab row
    a = np.where(valid, per * inv_freq, 0.0)
    b = np.where(valid, coff * inv_freq + phase, 0.0)
    return np.stack([a, b], axis=0).astype(np.float32)       # (2, cols)


def _pick_block_rows(slab_rows: int) -> int:
    # Small tables (<=1024 rows, <=512 KiB f32 at 128 lanes): one grid step --
    # splitting a ~us kernel only adds ~0.35 us/step pipeline overhead.
    if slab_rows <= 1024:
        return slab_rows
    # Larger tables: >=2 grid steps so dimension_semantics=("parallel",) can
    # shard row-blocks across v7x's two TensorCores.  Blocks capped at 4096
    # rows (2 MiB f32, 4 MiB double-buffered output) -- well inside v7x's
    # 64 MiB physical / 32 MiB default-scoped VMEM, and trivially inside
    # v5e/v6e's 128 MiB.
    cap = min(4096, slab_rows // 2)
    for br in (4096, 2048, 1024, 512, 256, 128, 64, 32, 16, 8):
        if br <= cap and slab_rows % br == 0:
            return br
    return slab_rows  # odd size: single full-slab step (block == full array dims)


@functools.lru_cache(maxsize=None)
def _pe_table(dim: int, max_pos: int, dtype_name: str = "float32"):
    """Build the full (max_pos, dim) sinusoidal table with a single pallas_call."""
    assert dim % 2 == 0, "dim must be even"
    out_dtype = jnp.dtype(dtype_name)
    slab_rows, cols, per = _plan(dim, max_pos)
    ab = jnp.asarray(_coefficients(dim, cols, per))            # (2, cols)
    block_rows = _pick_block_rows(slab_rows)

    slab = pl.pallas_call(
        _pe_kernel,
        out_shape=jax.ShapeDtypeStruct((slab_rows, cols), out_dtype),
        grid=(slab_rows // block_rows,),
        in_specs=[pl.BlockSpec((2, cols), lambda i: (0, 0))],
        out_specs=pl.BlockSpec((block_rows, cols), lambda i: (i, 0)),
        compiler_params=pltpu.CompilerParams(dimension_semantics=("parallel",)),
    )(ab)

    if per > 1:
        # Row-major flattening of the packed lane-dense slab IS the (max_pos, dim)
        # table, so this reshape is pure layout plumbing.
        return slab.reshape(max_pos, dim)
    if cols != dim:
        # Lane-padded layout: drop the zero pad lanes once, at build time.
        return slab[:, :dim]
    return slab


@functools.lru_cache(maxsize=None)
def _pe_slice(length: int, dim: int, max_pos: int, dtype_name: str):
    # Cached per (length, dim, max_pos, dtype): repeated forward(length) calls
    # cost a dict lookup, not a device slice + dispatch.
    return _pe_table(dim, max_pos, dtype_name)[:length]


def positional_encoding(length: int, dim: int, max_pos: int = 512,
                        dtype=jnp.float32):
    """JAX/Pallas equivalent of PositionalEncoding(dim, max_pos).forward(length)."""
    length = min(int(length), int(max_pos))   # matches pe[:length] slicing semantics
    return _pe_slice(length, int(dim), int(max_pos), jnp.dtype(dtype).name)


def _reference_np(length: int, dim: int, max_pos: int = 512):
    """float64 numpy ground truth mirroring the PyTorch construction exactly."""
    pos = np.arange(max_pos, dtype=np.float64)
    freq = np.exp((np.arange(dim // 2, dtype=np.float64) / dim) * math.log(10000.0))
    x = pos[:, None] / freq                                  # [L, dim//2]
    pe = np.stack((np.sin(x), np.cos(x)), axis=-1)           # [L, dim//2, 2]
    return pe.reshape(max_pos, dim)[:length]                 # interleaved (d sc)


if __name__ == "__main__":
    dim = 32
    max_pos = 512
    length = 8  # seq length requested at forward time

    # The torch module's `dummy` parameter only pins the device; initialize it
    # deterministically for parity (it does not affect the output values).
    key = jax.random.PRNGKey(0)
    dummy = jax.random.uniform(key, (1,), dtype=jnp.float32)

    enc = jax.block_until_ready(positional_encoding(length, dim, max_pos=max_pos))
    assert enc.shape == (length, dim)
    assert enc.dtype == jnp.float32
    np.testing.assert_allclose(
        np.asarray(enc), _reference_np(length, dim, max_pos), rtol=1e-5, atol=1e-5
    )

    # Repeated forward(length) is a pure cache hit (no re-slice / re-dispatch).
    assert positional_encoding(length, dim, max_pos=max_pos) is enc

    # Full-table sanity check. The kernel evaluates sin(pos*inv_freq + phase)
    # instead of {sin,cos}(pos/freq); at the largest angles (~max_pos rad) the
    # few-ulp reformulation difference is amplified, hence the looser atol.
    full = jax.block_until_ready(positional_encoding(max_pos, dim, max_pos=max_pos))
    np.testing.assert_allclose(
        np.asarray(full), _reference_np(max_pos, dim, max_pos), rtol=1e-5, atol=2.5e-4
    )

    # Non-divisor dim exercises the lane-padded path (cols padded to 128,
    # A=B=0 in pad lanes, sliced back to dim at build time).
    d2, mp2 = 48, 64
    enc48 = jax.block_until_ready(positional_encoding(mp2, d2, max_pos=mp2))
    assert enc48.shape == (mp2, d2)
    np.testing.assert_allclose(
        np.asarray(enc48), _reference_np(mp2, d2, max_pos=mp2), rtol=1e-5, atol=1e-4
    )

    # Optional bf16 output path (sin computed in f32, cast at the store).
    enc_bf16 = jax.block_until_ready(
        positional_encoding(max_pos, dim, max_pos=max_pos, dtype=jnp.bfloat16)
    )
    assert enc_bf16.dtype == jnp.bfloat16
    np.testing.assert_allclose(
        np.asarray(enc_bf16, dtype=np.float32),
        _reference_np(max_pos, dim, max_pos), rtol=2e-2, atol=1e-2,
    )

    print("KERNEL_OK")
</pallas_src>

<mosaic_0001>
module attributes {stable_mosaic.version = 11 : i64} {
  func.func @_pe_kernel(%arg0: i32, %arg1: memref<2x128xf32, #tpu.memory_space<vmem>>, %arg2: memref<128x128xf32, #tpu.memory_space<vmem>>) attributes {dimension_semantics = [#tpu.dimension_semantics<parallel>], iteration_bounds = array<i64: 1>, scalar_prefetch = 0 : i64, scratch_operands = 0 : i64, tpu.core_type = #tpu.core_type<tc>, window_params = [{pipeline_mode = #tpu.pipeline_mode<synchronous>, transform_indices = @transform_0, window_bounds = array<i64: 2, 128>}, {transform_indices = @transform_1, window_bounds = array<i64: 128, 128>}]} {
    %c128_i32 = arith.constant 128 : i32
    %0 = arith.muli %arg0, %c128_i32 : i32
    %1 = tpu.iota {dimensions = array<i32: 0>} : vector<128x128xi32>
    %2 = vector.broadcast %0 : i32 to vector<128x128xi32>
    %3 = arith.addi %1, %2 : vector<128x128xi32>
    %4 = arith.sitofp %3 : vector<128x128xi32> to vector<128x128xf32>
    %c0 = arith.constant 0 : index
    %c0_0 = arith.constant 0 : index
    %5 = vector.load %arg1[%c0, %c0_0] : memref<2x128xf32, #tpu.memory_space<vmem>>, vector<1x128xf32>
    %c1 = arith.constant 1 : index
    %c0_1 = arith.constant 0 : index
    %6 = vector.load %arg1[%c1, %c0_1] : memref<2x128xf32, #tpu.memory_space<vmem>>, vector<1x128xf32>
    %7 = vector.broadcast %5 : vector<1x128xf32> to vector<128x128xf32>
    %8 = arith.mulf %4, %7 : vector<128x128xf32>
    %9 = vector.broadcast %6 : vector<1x128xf32> to vector<128x128xf32>
    %10 = arith.addf %8, %9 : vector<128x128xf32>
    %11 = math.sin %10 : vector<128x128xf32>
    %c0_2 = arith.constant 0 : index
    %c0_3 = arith.constant 0 : index
    %12 = vector.load %arg2[%c0_2, %c0_3] : memref<128x128xf32, #tpu.memory_space<vmem>>, vector<128x128xf32>
    tpu.vector_store %arg2[%c0_2, %c0_3], %11 {strides = array<i32>} : memref<128x128xf32, #tpu.memory_space<vmem>>, vector<128x128xf32>,
    return
  }
  func.func @transform_0(%arg0: i32) -> (i32, i32) {
    %c0_i32 = arith.constant 0 : i32
    %c0_i32_0 = arith.constant 0 : i32
    %c0_i32_1 = arith.constant 0 : i32
    return %c0_i32, %c0_i32_0 : i32, i32
  }
  func.func @transform_1(%arg0: i32) -> (i32, i32) {
    %c0_i32 = arith.constant 0 : i32
    %c0_i32_0 = arith.constant 0 : i32
    return %arg0, %c0_i32 : i32, i32
  }
}

</mosaic_0001>

<bundles_post_ra>
// kernel: tpu_custom_call.1
= control target key start
LH: loop header
LB: loop body
LE: loop exit
PB: predicated region body
PF: predicated region fallthrough
CT: control target
= control target key end

     0   :  { %6 = vsyncpa [#allocation3], 0  ;;  %s3395_s0 = inlined_call_operand.hbm [shape: f32[2,128], index: 0, kind: input, shape index: {}]   ;;  %s3396_s1 = inlined_call_operand.hbm [shape: f32[128,128], index: 1, kind: output, shape index: {}]  }
   0x1   :  { %7 = vsyncpa [#allocation4], 0  ;;  %s2063_s6 = smov [#allocation2]   ;;  %s2015_s10 = scalar_lea.hbm %s3395_s0, 32 }
   0x2   :  { %s14_s7 = sshll.u32 %s2063_s6, 4  ;;  %p2016_p0 = scmp.ne.s32.totalorder %s3395_s0, %s2015_s10  ;;  %s15_s7 = int_to_ptr.vmem [resolvable:$true] %s14_s7 }
   0x3   :  { %p2019_p1 = scmp.lt.u32.totalorder %s2015_s10, %s3395_s0 }
   0x5   :  { %p2021_p2 = pnand %p2019_p1, %p2016_p0 }
   0x7   :  { %2024 = shalt.err (!%p2021_p2)
}
   0x8   :  { %s2025_s15 = scalar_lea.vmem %s15_s7, 32  ;;  %p2030_p4 = scmp.lt.s32.totalorder %s15_s7, %s15_s7 }
   0x9   :  { %p2026_p3 = scmp.ne.s32.totalorder %s15_s7, %s2025_s15  ;;  %p2031_p5 = scmp.lt.s32.totalorder %s2025_s15, %s2025_s15 }
   0xb   :  { %p2032_p6 = por %p2031_p5, %p2030_p4 }
   0xd   :  { %p2033_p7 = pnand %p2032_p6, %p2026_p3 }
   0xf   :  { %2036 = shalt.err (!%p2033_p7)
}
  0x10   :  { %17 = dma.hbm_to_vmem [thread:$0]  %s3395_s0, 32, %s15_s7, [#allocation3]  }
  0x11   :  { %2059 = dma.done.wait [#allocation3], 32  }
  0x12   :  { %2060 = vsyncadd [#allocation3], 4294967264  ;;  %v22_v0 = vlaneseq  ;;  %v1811_v23 = vld [vmem:[#allocation2] ss:$0 sm:$0xff]  ;;  %v1812_v36 = vld [vmem:[#allocation2 + $0x1] ss:$0 sm:$0xff] }
  0x13   :  { %s2070_s0 = smov [#allocation5]  }
  0x14   :  { %v23_v1 = vshrl.u32 %v22_v0, 7  ;;  %s1799_s18 = sshll.u32 %s2070_s0, 4  ;;  %s1800_s18 = int_to_ptr.vmem [resolvable:$true] %s1799_s18 }
  0x15   :  { %s2037_s19 = scalar_lea.vmem %s1800_s18, 2048  ;;  %p2042_p9 = scmp.lt.s32.totalorder %s1800_s18, %s1800_s18 }
  0x16   :  { %v24_v2 = vadd.s32 8, %v23_v1  ;;  %v27_v3 = vadd.s32 32, %v23_v1  ;;  %v28_v4 = vadd.s32 40, %v23_v1  ;;  %v29_v5 = vadd.s32 48, %v23_v1  ;;  %p2038_p8 = scmp.ne.s32.totalorder %s1800_s18, %s2037_s19  ;;  %p2043_p10 = scmp.lt.s32.totalorder %s2037_s19, %s2037_s19 }
  0x17   :  { %v30_v6 = vadd.s32 56, %v23_v1  ;;  %v31_v7 = vadd.s32 64, %v23_v1  ;;  %v32_v8 = vadd.s32 72, %v23_v1  ;;  %v33_v9 = vadd.s32 80, %v23_v1 }
  0x18   :  { %v34_v10 = vadd.s32 88, %v23_v1  ;;  %v35_v11 = vadd.s32 96, %v23_v1  ;;  %v36_v12 = vadd.s32 104, %v23_v1  ;;  %v37_v13 = vadd.s32 112, %v23_v1  ;;  %p2044_p11 = por %p2043_p10, %p2042_p9 }
  0x19   :  { %v38_v14 = vadd.s32 120, %v23_v1  ;;  %v25_v15 = vadd.s32 16, %v23_v1  ;;  %v56_v16 = vcvt.s32.f32 %v23_v1  ;;  %v57_v17 = vcvt.s32.f32 %v24_v2 }
  0x1a   :  { %v60_v18 = vcvt.s32.f32 %v27_v3  ;;  %v61_v19 = vcvt.s32.f32 %v28_v4  ;;  %v62_v20 = vcvt.s32.f32 %v29_v5  ;;  %v63_v21 = vcvt.s32.f32 %v30_v6  ;;  %p2045_p12 = pnand %p2044_p11, %p2038_p8 }
  0x1b   :  { %v64_v22 = vcvt.s32.f32 %v31_v7  ;;  %v65_v24 = vcvt.s32.f32 %v32_v8  ;;  %v66_v25 = vcvt.s32.f32 %v33_v9  ;;  %v67_v26 = vcvt.s32.f32 %v34_v10 }
  0x1c   :  { %v68_v27 = vcvt.s32.f32 %v35_v11  ;;  %v26_v28 = vadd.s32 24, %v23_v1  ;;  %v69_v29 = vcvt.s32.f32 %v36_v12  ;;  %v70_v30 = vcvt.s32.f32 %v37_v13 }
  0x1d   :  { %v71_v31 = vcvt.s32.f32 %v38_v14  ;;  %v58_v32 = vcvt.s32.f32 %v25_v15  ;;  %v78_v33 = vmul.f32 %v1811_v23, %v56_v16  ;;  %v79_v34 = vmul.f32 %v1811_v23, %v57_v17 }
  0x1e   :  { %v82_v35 = vmul.f32 %v1811_v23, %v60_v18  ;;  %v83_v37 = vmul.f32 %v1811_v23, %v61_v19  ;;  %v84_v38 = vmul.f32 %v1811_v23, %v62_v20  ;;  %v85_v39 = vmul.f32 %v1811_v23, %v63_v21 }
  0x1f   :  { %v86_v40 = vmul.f32 %v1811_v23, %v64_v22  ;;  %v87_v41 = vmul.f32 %v1811_v23, %v65_v24  ;;  %v88_v42 = vmul.f32 %v1811_v23, %v66_v25  ;;  %v89_v43 = vmul.f32 %v1811_v23, %v67_v26 }
  0x20   :  { %v90_v44 = vmul.f32 %v1811_v23, %v68_v27  ;;  %v59_v45 = vcvt.s32.f32 %v26_v28  ;;  %v91_v46 = vmul.f32 %v1811_v23, %v69_v29  ;;  %v92_v47 = vmul.f32 %v1811_v23, %v70_v30 }
  0x21   :  { %v93_v48 = vmul.f32 %v1811_v23, %v71_v31  ;;  %v80_v49 = vmul.f32 %v1811_v23, %v58_v32  ;;  %v2095_v50 = vadd.f32 %v1812_v36, %v78_v33  ;;  %v2097_v51 = vadd.f32 %v1812_v36, %v79_v34 }
  0x22   :  { %v2099_v52 = vadd.f32 %v1812_v36, %v82_v35  ;;  %v2101_v53 = vadd.f32 %v1812_v36, %v83_v37  ;;  %v2103_v54 = vadd.f32 %v1812_v36, %v84_v38  ;;  %v2105_v55 = vadd.f32 %v1812_v36, %v85_v39 }
  0x23   :  { %v2107_v56 = vadd.f32 %v1812_v36, %v86_v40  ;;  %v2109_v57 = vadd.f32 %v1812_v36, %v87_v41  ;;  %v2111_v58 = vadd.f32 %v1812_v36, %v88_v42  ;;  %v2113_v59 = vadd.f32 %v1812_v36, %v89_v43 }
  0x24   :  { %v2115_v60 = vadd.f32 %v1812_v36, %v90_v44  ;;  %v2117_v61 = vadd.f32 %v1812_v36, %v91_v46  ;;  %v2119_v62 = vadd.f32 %v1812_v36, %v92_v47  ;;  %v2121_v63 = vadd.f32 %v1812_v36, %v93_v48 }
  0x25   :  { %v114_v0 = vand.u32 2147483647, %v2095_v50  ;;  %v2124_v1 = vadd.f32 %v1812_v36, %v80_v49  ;;  %v117_v2 = vand.u32 2139095040, %v2095_v50  ;;  %v218_v3 = vand.u32 2147483647, %v2097_v51 }
  0x26   :  { %v221_v5 = vand.u32 2139095040, %v2097_v51  ;;  %v81_v7 = vmul.f32 %v1811_v23, %v59_v45  ;;  %v2064_v32 = vmov 683565275   ;;  %v2065_v34 = vmov 2475754826  }
  0x27   :  { %v121_v4 = vand.u32 8388607, %v114_v0  ;;  %v118_v6 = vshrl.u32 %v117_v2, 23  ;;  %v225_v9 = vand.u32 8388607, %v218_v3  ;;  %v325_v11 = vand.u32 2139095040, %v2124_v1 }
  0x28   :  { %v222_v8 = vshrl.u32 %v221_v5, 23  ;;  %v322_v15 = vand.u32 2147483647, %v2124_v1  ;;  %v2135_v17 = vadd.f32 %v1812_v36, %v81_v7  ;;  %v2066_v36 = vmov 2131351028  }
  0x29   :  { %v1813_v10 = vadd.s32 4294967169, %v118_v6  ;;  %v122_v12 = vor.u32 8388608, %v121_v4  ;;  %v326_v16 = vshrl.u32 %v325_v11, 23  ;;  %v226_v18 = vor.u32 8388608, %v225_v9 }
  0x2a   :  { %v1817_v13 = vadd.s32 4294967169, %v222_v8  ;;  %v2141_v26 = vand.u32 8388607, %v322_v15  ;;  %v429_v30 = vand.u32 2139095040, %v2135_v17  ;;  %v2067_v38 = vmov 2102212464  }
  0x2b   :  { %v124_v14 = vadd.s32 1, %v1813_v10  ;;  %v1821_v20 = vadd.s32 4294967169, %v326_v16  ;;  %v2137_v22 = vshll.u32 %v122_v12, 8  ;;  %v2143_v28 = vshll.u32 %v226_v18, 8 }
  0x2c   :  { %v228_v19 = vadd.s32 1, %v1817_v13  ;;  %v2068_v40 = vmov 920167782   ;;  %v2069_v48 = vmov 1326507024   ;;  %vm116_vm13 = vcmp.lt.s32.totalorder %v2095_v50, 0 }
  0x2d   :  { %vm125_vm0 = vcmp.gt.s32.totalorder %v124_v14, 0  ;;  %v2145_v29 = vadd.s32 1, %v1821_v20  ;;  %vm2248_vm14 = vcmp.le.f32.partialorder %v114_v0, 0.7853982  ;;  %vm220_vm15 = vcmp.lt.s32.totalorder %v2097_v51, 0 }
  0x2e   :  { %v126_v21 = vsel %vm125_vm0, %v124_v14, 0  ;;  %vm229_vm1 = vcmp.gt.s32.totalorder %v228_v19, 0 }
  0x2f   :  { %v127_v23 = vshrl.u32 %v126_v21, 5  ;;  %v128_v24 = vand.u32 31, %v126_v21  ;;  %v230_v25 = vsel %vm229_vm1, %v228_v19, 0  ;;  %vm333_vm11 = vcmp.gt.s32.totalorder %v2145_v29, 0 }
  0x30   :  { %v232_v27 = vand.u32 31, %v230_v25  ;;  %v2153_v42 = vshrl.u32 %v230_v25, 5 }
  0x31   :  { %v129_v31 = vsub.s32 32, %v128_v24  ;;  %v131_v33 = vshll.u32 %v2064_v32, %v128_v24  ;;  %v134_v35 = vshll.u32 %v2065_v34, %v128_v24  ;;  %v137_v37 = vshll.u32 %v2066_v36, %v128_v24 }
  0x32   :  { %v140_v39 = vshll.u32 %v2067_v38, %v128_v24  ;;  %v143_v41 = vshll.u32 %v2068_v40, %v128_v24  ;;  %vm146_vm2 = vcmp.lt.s32.totalorder %v127_v23, 1  ;;  %vm147_vm3 = vcmp.lt.s32.totalorder %v127_v23, 2 }
  0x33   :  { %v130_v43 = vshrl.u32 %v2064_v32, %v129_v31  ;;  %v132_v44 = vshrl.u32 %v2065_v34, %v129_v31  ;;  %v135_v45 = vshrl.u32 %v2066_v36, %v129_v31  ;;  %v138_v46 = vshrl.u32 %v2067_v38, %v129_v31 }
  0x34   :  { %v141_v47 = vshrl.u32 %v2068_v40, %v129_v31  ;;  %v144_v49 = vshrl.u32 %v2069_v48, %v129_v31  ;;  %vm149_vm4 = vcmp.lt.s32.totalorder %v127_v23, 4  ;;  %v233_v6 = vsub.s32 32, %v232_v27 }
  0x35   :  { %v133_v2 = vor.u32 %v132_v44, %v131_v33  ;;  %v136_v4 = vor.u32 %v135_v45, %v134_v35  ;;  %v139_v5 = vor.u32 %v138_v46, %v137_v37  ;;  %vm148_vm5 = vcmp.lt.s32.totalorder %v127_v23, 3 }
  0x36   :  { %v142_v7 = vor.u32 %v141_v47, %v140_v39  ;;  %v145_v8 = vor.u32 %v144_v49, %v143_v41  ;;  %v235_v9 = vshll.u32 %v2064_v32, %v232_v27  ;;  %v238_v19 = vshll.u32 %v2065_v34, %v232_v27 }
  0x37   :  { %v150_v10 = vsel %vm146_vm2, %v130_v43, %v133_v2  ;;  %v151_v11 = vsel %vm149_vm4, %v139_v5, 2102212464  ;;  %v154_v12 = vsel %vm146_vm2, %v133_v2, %v136_v4  ;;  %v158_v13 = vsel %vm146_vm2, %v136_v4, %v139_v5 }
  0x38   :  { %v152_v14 = vsel %vm148_vm5, %v136_v4, %v151_v11  ;;  %v155_v16 = vsel %vm149_vm4, %v142_v7, 920167782  ;;  %v159_v18 = vsel %vm149_vm4, %v145_v8, 1326507024  ;;  %v234_v24 = vshrl.u32 %v2064_v32, %v233_v6 }
  0x39   :  { %v156_v20 = vsel %vm148_vm5, %v139_v5, %v155_v16  ;;  %v160_v21 = vsel %vm148_vm5, %v142_v7, %v159_v18  ;;  %v236_v25 = vshrl.u32 %v2065_v34, %v233_v6  ;;  %v153_v31 = vsel %vm147_vm3, %v150_v10, %v152_v14 }
  0x3a   :  { %v157_v33 = vsel %vm147_vm3, %v154_v12, %v156_v20  ;;  %v161_v35 = vsel %vm147_vm3, %v158_v13, %v160_v21  ;;  %v239_v37 = vshrl.u32 %v2066_v36, %v233_v6  ;;  %v241_v47 = vshll.u32 %v2066_v36, %v232_v27 }
  0x3b   :  { %v2173_v39 = vmul.u32.u64.low %v2137_v22, %v161_v35  ;;  %v2174_v41 = vmul.u32.u64.high %v2137_v22, %v161_v35, %v2173_v39  ;;  %v2177_v43 = vmul.u32.u64.low %v2137_v22, %v157_v33  ;;  %v2178_v44 = vmul.u32.u64.high %v2137_v22, %v157_v33, %v2177_v43 }
  0x3c   :  { %v237_v45 = vor.u32 %v236_v25, %v235_v9  ;;  %v240_v46 = vor.u32 %v239_v37, %v238_v19  ;;  %v242_v49 = vshrl.u32 %v2067_v38, %v233_v6  ;;  %v244_v23 = vshll.u32 %v2067_v38, %v232_v27 }
  0x3d   :  { %v245_v2 = vshrl.u32 %v2068_v40, %v233_v6  ;;  %v247_v4 = vshll.u32 %v2068_v40, %v232_v27  ;;  %v248_v5 = vshrl.u32 %v2069_v48, %v233_v6  ;;  %v169_v7 = vmul.u32 %v2137_v22, %v153_v31 }
  0x3e   :  { %v243_v8 = vor.u32 %v242_v49, %v241_v47  ;;  %vm250_vm6 = vcmp.lt.s32.totalorder %v2153_v42, 1  ;;  %vm251_vm7 = vcmp.lt.s32.totalorder %v2153_v42, 2  ;;  %vm171_vm8 = vc.u32 %v2174_v41, %v2177_v43 }
  0x3f   :  { %v172_v9 = vadd.s32 1, %v2178_v44  ;;  %v246_v10 = vor.u32 %v245_v2, %v244_v23  ;;  %vm252_vm9 = vcmp.lt.s32.totalorder %v2153_v42, 3  ;;  %v249_v11 = vor.u32 %v248_v5, %v247_v4 }
  0x40   :  { %vm253_vm10 = vcmp.lt.s32.totalorder %v2153_v42, 4  ;;  %v254_v27 = vsel %vm250_vm6, %v234_v24, %v237_v45  ;;  %v258_v6 = vsel %vm250_vm6, %v237_v45, %v240_v46  ;;  %v262_v14 = vsel %vm250_vm6, %v240_v46, %v243_v8 }
  0x41   :  { %v173_v22 = vsel %vm171_vm8, %v172_v9, %v2178_v44  ;;  %v255_v12 = vsel %vm253_vm10, %v243_v8, 2102212464  ;;  %v259_v13 = vsel %vm253_vm10, %v246_v10, 920167782  ;;  %v263_v20 = vsel %vm253_vm10, %v249_v11, 1326507024 }
  0x42   :  { %v174_v16 = vadd.s32 %v173_v22, %v169_v7  ;;  %v256_v18 = vsel %vm252_vm9, %v240_v46, %v255_v12  ;;  %v260_v19 = vsel %vm252_vm9, %v243_v8, %v259_v13  ;;  %v264_v31 = vsel %vm252_vm9, %v246_v10, %v263_v20 }
  0x43   :  { %v257_v21 = vsel %vm251_vm7, %v254_v27, %v256_v18  ;;  %v261_v25 = vsel %vm251_vm7, %v258_v6, %v260_v19  ;;  %v265_v33 = vsel %vm251_vm7, %v262_v14, %v264_v31  ;;  %v334_v45 = vsel %vm333_vm11, %v2145_v29, 0 }
  0x44   :  { %v175_v24 = vadd.s32 536870912, %v174_v16  ;;  %v2204_v35 = vmul.u32.u64.low %v2143_v28, %v261_v25  ;;  %v2205_v37 = vmul.u32.u64.high %v2143_v28, %v261_v25, %v2204_v35  ;;  %v336_v47 = vand.u32 31, %v334_v45 }
  0x45   :  { %v2209_v39 = vmul.u32.u64.low %v2143_v28, %v265_v33  ;;  %v2210_v44 = vmul.u32.u64.high %v2143_v28, %v265_v33, %v2209_v39  ;;  %v426_v49 = vand.u32 2147483647, %v2135_v17  ;;  %v273_v23 = vmul.u32 %v2143_v28, %v257_v21 }
  0x46   :  { %v176_v46 = vshrl.u32 %v175_v24, 30  ;;  %v330_v42 = vor.u32 8388608, %v2141_v26  ;;  %v430_v2 = vshrl.u32 %v429_v30, 23  ;;  %v276_v5 = vadd.s32 1, %v2205_v37 }
  0x47   :  { %vm275_vm12 = vc.u32 %v2210_v44, %v2204_v35  ;;  %v337_v7 = vsub.s32 32, %v336_v47  ;;  %v2227_v28 = vand.u32 8388607, %v426_v49  ;;  %v2229_v9 = vshrl.u32 %v334_v45, 5 }
  0x48   :  { %v177_v4 = vshll.u32 %v176_v46, 30  ;;  %v277_v8 = vsel %vm275_vm12, %v276_v5, %v2205_v37  ;;  %v2231_v30 = vshll.u32 %v330_v42, 8  ;;  %v1825_v10 = vadd.s32 4294967169, %v430_v2 }
  0x49   :  { %v278_v26 = vadd.s32 %v277_v8, %v273_v23  ;;  %v200_v27 = vsub.s32 4, %v176_v46  ;;  %v339_v6 = vshll.u32 %v2064_v32, %v336_v47  ;;  %v342_v22 = vshll.u32 %v2065_v34, %v336_v47 }
  0x4a   :  { %v2222_v29 = vsub.s32 %v174_v16, %v177_v4  ;;  %v340_v13 = vshrl.u32 %v2065_v34, %v337_v7  ;;  %v343_v14 = vshrl.u32 %v2066_v36, %v337_v7  ;;  %v345_v16 = vshll.u32 %v2066_v36, %v336_v47 }
  0x4b   :  { %v279_v12 = vadd.s32 536870912, %v278_v26  ;;  %v346_v19 = vshrl.u32 %v2067_v38, %v337_v7  ;;  %v348_v20 = vshll.u32 %v2067_v38, %v336_v47  ;;  %v349_v21 = vshrl.u32 %v2068_v40, %v337_v7 }
  0x4c   :  { %v180_v11 = vsub.s32 0, %v2222_v29  ;;  %v351_v31 = vshll.u32 %v2068_v40, %v336_v47  ;;  %v352_v24 = vshrl.u32 %v2069_v48, %v337_v7  ;;  %v434_v33 = vor.u32 8388608, %v2227_v28 }
  0x4d   :  { %v280_v25 = vshrl.u32 %v279_v12, 30  ;;  %v170_v39 = vadd.s32 %v2177_v43, %v2174_v41  ;;  %v201_v23 = vsel %vm116_vm13, %v200_v27, %v176_v46  ;;  %v436_v47 = vadd.s32 1, %v1825_v10 }
  0x4e   :  { %v1814_v18 = vmin.u32 %v180_v11, %v2222_v29  ;;  %v338_v2 = vshrl.u32 %v2064_v32, %v337_v7  ;;  %v341_v4 = vor.u32 %v340_v13, %v339_v6  ;;  %v344_v5 = vor.u32 %v343_v14, %v342_v22 }
  0x4f   :  { %v281_v42 = vshll.u32 %v280_v25, 30  ;;  %v347_v0 = vor.u32 %v346_v19, %v345_v16  ;;  %v350_v11 = vor.u32 %v349_v21, %v348_v20  ;;  %vm354_vm0 = vcmp.lt.s32.totalorder %v2229_v9, 1 }
  0x50   :  { %v182_v45 = vclz %v1814_v18  ;;  %v304_v41 = vsub.s32 4, %v280_v25  ;;  %v353_v43 = vor.u32 %v352_v24, %v351_v31  ;;  %vm357_vm1 = vcmp.lt.s32.totalorder %v2229_v9, 4 }
  0x51   :  { %v2259_v12 = vsub.s32 %v278_v26, %v281_v42  ;;  %vm2264_vm3 = vcmp.le.f32.partialorder %v218_v3, 0.7853982  ;;  %vm355_vm4 = vcmp.lt.s32.totalorder %v2229_v9, 2  ;;  %vm356_vm5 = vcmp.lt.s32.totalorder %v2229_v9, 3 }
  0x52   :  { %v1815_v8 = vadd.s32 4294967294, %v182_v45  ;;  %v359_v7 = vsel %vm357_vm1, %v347_v0, 2102212464  ;;  %v358_v27 = vsel %vm354_vm0, %v338_v2, %v341_v4  ;;  %v362_v6 = vsel %vm354_vm0, %v341_v4, %v344_v5 }
  0x53   :  { %v284_v10 = vsub.s32 0, %v2259_v12  ;;  %v363_v14 = vsel %vm357_vm1, %v350_v11, 920167782  ;;  %v360_v18 = vsel %vm356_vm5, %v344_v5, %v359_v7  ;;  %v366_v20 = vsel %vm354_vm0, %v344_v5, %v347_v0 }
  0x54   :  { %vm1816_vm2 = vcmp.lt.s32.totalorder %v1815_v8, 0  ;;  %v364_v19 = vsel %vm356_vm5, %v347_v0, %v363_v14  ;;  %v367_v24 = vsel %vm357_vm1, %v353_v43, 1326507024  ;;  %v203_v45 = vsel %vm2248_vm14, 0, %v201_v23 }
  0x55   :  { %v185_v26 = vsel %vm1816_vm2, 0, %v1815_v8  ;;  %v1818_v16 = vmin.u32 %v284_v10, %v2259_v12  ;;  %v274_v42 = vadd.s32 %v2204_v35, %v2210_v44  ;;  %v305_v4 = vsel %vm220_vm15, %v304_v41, %v280_v25 }
  0x56   :  { %v186_v3 = vsub.s32 32, %v185_v26  ;;  %v187_v22 = vshll.u32 %v2222_v29, %v185_v26  ;;  %v190_v13 = vsub.s32 4294967266, %v185_v26  ;;  %v365_v29 = vsel %vm355_vm4, %v362_v6, %v364_v19 }
  0x57   :  { %v286_v2 = vclz %v1818_v16  ;;  %v368_v0 = vsel %vm356_vm5, %v350_v11, %v367_v24  ;;  %v2304_v23 = vmul.u32.u64.low %v2231_v30, %v365_v29  ;;  %v2305_v26 = vmul.u32.u64.high %v2231_v30, %v365_v29, %v2304_v23 }
  0x58   :  { %v188_v21 = vshrl.u32 %v170_v39, %v186_v3  ;;  %v191_v31 = vadd.s32 127, %v190_v13  ;;  %v361_v39 = vsel %vm355_vm4, %v358_v27, %v360_v18  ;;  %v369_v43 = vsel %vm355_vm4, %v366_v20, %v368_v0 }
  0x59   :  { %v1819_v7 = vadd.s32 4294967294, %v286_v2  ;;  %v2309_v25 = vmul.u32.u64.low %v2231_v30, %v369_v43  ;;  %v2310_v41 = vmul.u32.u64.high %v2231_v30, %v369_v43, %v2309_v25  ;;  %v207_v10 = vadd.s32 3, %v203_v45 }
  0x5a   :  { %v189_v8 = vor.u32 %v188_v21, %v187_v22  ;;  %v192_v5 = vshll.u32 %v191_v31, 23  ;;  %v307_v11 = vsel %vm2264_vm3, 0, %v305_v4  ;;  %vm437_vm7 = vcmp.gt.s32.totalorder %v436_v47, 0 }
  0x5b   :  { %vm1820_vm6 = vcmp.lt.s32.totalorder %v1819_v7, 0  ;;  %v377_v6 = vmul.u32 %v2231_v30, %v361_v39  ;;  %v438_v3 = vsel %vm437_vm7, %v436_v47, 0  ;;  %v380_v16 = vadd.s32 1, %v2305_v26 }
  0x5c   :  { %v193_v35 = vor.u32 4788187, %v192_v5  ;;  %v196_v44 = vcvt.s32.f32 %v189_v8  ;;  %v289_v9 = vsel %vm1820_vm6, 0, %v1819_v7  ;;  %vm379_vm8 = vc.u32 %v2310_v41, %v2304_v23 }
  0x5d   :  { %v290_v22 = vsub.s32 32, %v289_v9  ;;  %v291_v13 = vshll.u32 %v2259_v12, %v289_v9  ;;  %v294_v14 = vsub.s32 4294967266, %v289_v9  ;;  %v2321_v19 = vshll.u32 %v434_v33, 8 }
  0x5e   :  { %v194_v27 = vand.u32 2147483647, %v193_v35  ;;  %v530_v20 = vand.u32 2147483647, %v2099_v52  ;;  %v381_v30 = vsel %vm379_vm8, %v380_v16, %v2305_v26  ;;  %v440_v47 = vand.u32 31, %v438_v3 }
  0x5f   :  { %v292_v21 = vshrl.u32 %v274_v42, %v290_v22  ;;  %v295_v31 = vadd.s32 127, %v294_v14  ;;  %v2325_v12 = vand.u32 3, %v207_v10  ;;  %v311_v24 = vadd.s32 3, %v307_v11 }
  0x60   :  { %v197_v18 = vmul.f32 %v196_v44, %v194_v27  ;;  %v382_v45 = vadd.s32 %v381_v30, %v377_v6  ;;  %v2327_v8 = vshrl.u32 %v438_v3, 5  ;;  %v441_v5 = vsub.s32 32, %v440_v47 }
  0x61   :  { %v293_v2 = vor.u32 %v292_v21, %v291_v13  ;;  %v296_v4 = vshll.u32 %v295_v31, 23  ;;  %v443_v42 = vshll.u32 %v2064_v32, %v440_v47  ;;  %v446_v39 = vshll.u32 %v2065_v34, %v440_v47 }
  0x62   :  { %v198_v29 = vxor.u32 2147483648, %v197_v18  ;;  %v383_v33 = vadd.s32 536870912, %v382_v45  ;;  %v449_v26 = vshll.u32 %v2066_v36, %v440_v47  ;;  %v444_v44 = vshrl.u32 %v2065_v34, %v441_v5 }
  0x63   :  { %v297_v7 = vor.u32 4788187, %v296_v4  ;;  %v300_v43 = vcvt.s32.f32 %v293_v2  ;;  %v447_v25 = vshrl.u32 %v2066_v36, %v441_v5  ;;  %v450_v11 = vshrl.u32 %v2067_v38, %v441_v5 }
  0x64   :  { %v199_v28 = vsel %vm116_vm13, %v198_v29, %v197_v18  ;;  %v384_v35 = vshrl.u32 %v383_v33, 30  ;;  %v452_v27 = vshll.u32 %v2067_v38, %v440_v47  ;;  %vm213_vm9 = vcmp.eq.s32.totalorder %v2325_v12, 2 }
  0x65   :  { %v202_v0 = vsel %vm2248_vm14, %v2095_v50, %v199_v28  ;;  %v298_v10 = vand.u32 2147483647, %v297_v7  ;;  %v2342_v37 = vand.u32 3, %v311_v24  ;;  %vm324_vm10 = vcmp.lt.s32.totalorder %v2124_v1, 0 }
  0x66   :  { %1951 = vcosq.f32 %v202_v0  ;;  %v385_v9 = vshll.u32 %v384_v35, 30  ;;  %vm458_vm11 = vcmp.lt.s32.totalorder %v2327_v8, 1  ;;  %vm210_vm12 = vcmp.eq.s32.totalorder %v2325_v12, 0 }
  0x67   :  { %1953 = vsinq.f32 %v202_v0  ;;  %v301_v6 = vmul.f32 %v300_v43, %v298_v10  ;;  %v442_v3 = vshrl.u32 %v2064_v32, %v441_v5  ;;  %v453_v22 = vshrl.u32 %v2068_v40, %v441_v5 }
  0x68   :  { %v455_v13 = vshll.u32 %v2068_v40, %v440_v47  ;;  %vm209_vm13 = vcmp.lt.s32.totalorder %v2325_v12, 2  ;;  %v2351_v14 = vsub.s32 %v382_v45, %v385_v9  ;;  %v445_v16 = vor.u32 %v444_v44, %v443_v42 }
  0x69   :  { %v448_v18 = vor.u32 %v447_v25, %v446_v39  ;;  %v456_v21 = vshrl.u32 %v2069_v48, %v441_v5  ;;  %vm206_vm14 = vweird.f32 %v2095_v50  ;;  %v302_v31 = vxor.u32 2147483648, %v301_v6 }
  0x6a   :  { %v451_v30 = vor.u32 %v450_v11, %v449_v26  ;;  %v454_v29 = vor.u32 %v453_v22, %v452_v27  ;;  %vm461_vm0 = vcmp.lt.s32.totalorder %v2327_v8, 4  ;;  %v388_v24 = vsub.s32 0, %v2351_v14 }
  0x6b   :  { %v408_v2 = vsub.s32 4, %v384_v35  ;;  %vm460_vm1 = vcmp.lt.s32.totalorder %v2327_v8, 3  ;;  %v533_v47 = vand.u32 2139095040, %v2099_v52  ;;  %v303_v45 = vsel %vm220_vm15, %v302_v31, %v301_v6 }
  0x6c   :  { %v457_v4 = vor.u32 %v456_v21, %v455_v13  ;;  %v463_v5 = vsel %vm461_vm0, %v451_v30, 2102212464  ;;  %v467_v28 = vsel %vm461_vm0, %v454_v29, 920167782  ;;  %v306_v33 = vsel %vm2264_vm3, %v2097_v51, %v303_v45 }
  0x6d   :  { %v1822_v42 = vmin.u32 %v388_v24, %v2351_v14  ;;  %vm459_vm2 = vcmp.lt.s32.totalorder %v2327_v8, 2  ;;  %v466_v39 = vsel %vm458_vm11, %v445_v16, %v448_v18  ;;  %1955 = vcosq.f32 %v306_v33 }
  0x6e   :  { %v462_v0 = vsel %vm458_vm11, %v442_v3, %v445_v16  ;;  %v464_v7 = vsel %vm460_vm1, %v448_v18, %v463_v5  ;;  %v468_v43 = vsel %vm460_vm1, %v451_v30, %v467_v28  ;;  %1957 = vsinq.f32 %v306_v33 }
  0x6f   :  { %v378_v46 = vadd.s32 %v2304_v23, %v2310_v41  ;;  %v390_v44 = vclz %v1822_v42  ;;  %v470_v25 = vsel %vm458_vm11, %v448_v18, %v451_v30  ;;  %v409_v27 = vsel %vm324_vm10, %v408_v2, %v384_v35 }
  0x70   :  { %v1952_v26 = vpop.eup %1951  ;;  %v469_v9 = vsel %vm459_vm2, %v466_v39, %v468_v43  ;;  %v471_v6 = vsel %vm461_vm0, %v457_v4, 1326507024  ;;  %v465_v23 = vsel %vm459_vm2, %v462_v0, %v464_v7  ;;  %v534_v2 = vshrl.u32 %v533_v47, 23 }
  0x71   :  { %v1954_v10 = vpop.eup %1953  ;;  %v214_v11 = vxor.u32 2147483648, %v1952_v26  ;;  %v1823_v22 = vadd.s32 4294967294, %v390_v44  ;;  %v472_v41 = vsel %vm460_vm1, %v454_v29, %v471_v6  ;;  %v481_v8 = vmul.u32 %v2321_v19, %v465_v23 }
  0x72   :  { %v211_v3 = vxor.u32 2147483648, %v1954_v10  ;;  %v473_v35 = vsel %vm459_vm2, %v470_v25, %v472_v41  ;;  %v2397_v16 = vmul.u32.u64.low %v2321_v19, %v469_v9  ;;  %v2398_v18 = vmul.u32.u64.high %v2321_v19, %v469_v9, %v2397_v16 }
  0x73   :  { %v215_v13 = vsel %vm213_vm9, %v214_v11, %v1954_v10  ;;  %vm1824_vm15 = vcmp.lt.s32.totalorder %v1823_v22, 0  ;;  %v2404_v31 = vmul.u32.u64.low %v2321_v19, %v473_v35  ;;  %v2405_v30 = vmul.u32.u64.high %v2321_v19, %v473_v35, %v2404_v31 }
  0x74   :  { %v212_v21 = vsel %vm210_vm12, %v1952_v26, %v211_v3  ;;  %v393_v24 = vsel %vm1824_vm15, 0, %v1823_v22  ;;  %vm314_vm3 = vcmp.eq.s32.totalorder %v2342_v37, 0  ;;  %vm2416_vm4 = vcmp.le.f32.partialorder %v322_v15, 0.7853982 }
  0x75   :  { %v216_v29 = vsel %vm209_vm13, %v212_v21, %v215_v13  ;;  %v394_v4 = vsub.s32 32, %v393_v24  ;;  %v395_v5 = vshll.u32 %v2351_v14, %v393_v24  ;;  %v398_v28 = vsub.s32 4294967266, %v393_v24 }
  0x76   :  { %v217_v45 = vsel %vm206_vm14, nan, %v216_v29  ;;  %v484_v12 = vadd.s32 1, %v2398_v18  ;;  %v1829_v42 = vadd.s32 4294967169, %v534_v2  ;;  %vm317_vm5 = vcmp.eq.s32.totalorder %v2342_v37, 2 }
  0x77   :  { %1778 = vst [vmem:[#allocation5] sm:$0xff] %v217_v45  ;;  %v396_v50 = vshrl.u32 %v378_v46, %v394_v4  ;;  %v399_v19 = vadd.s32 127, %v398_v28  ;;  %vm483_vm6 = vc.u32 %v2405_v30, %v2397_v16  ;;  %v1956_v14 = vpop.eup %1955  ;;  %v411_v47 = vsel %vm2416_vm4, 0, %v409_v27 }
  0x78   :  { %v485_v15 = vsel %vm483_vm6, %v484_v12, %v2398_v18  ;;  %v537_v39 = vand.u32 8388607, %v530_v20  ;;  %v540_v0 = vadd.s32 1, %v1829_v42  ;;  %v1958_v7 = vpop.eup %1957  ;;  %v318_v43 = vxor.u32 2147483648, %v1956_v14 }
  0x79   :  { %v397_v26 = vor.u32 %v396_v50, %v395_v5  ;;  %v400_v44 = vshll.u32 %v399_v19, 23  ;;  %v486_v25 = vadd.s32 %v485_v15, %v481_v8  ;;  %vm310_vm7 = vweird.f32 %v2097_v51 }
  0x7a   :  { %vm313_vm8 = vcmp.lt.s32.totalorder %v2342_v37, 2  ;;  %v315_v46 = vxor.u32 2147483648, %v1958_v7  ;;  %vm541_vm9 = vcmp.gt.s32.totalorder %v540_v0, 0  ;;  %v319_v10 = vsel %vm317_vm5, %v318_v43, %v1958_v7 }
  0x7b   :  { %v401_v11 = vor.u32 4788187, %v400_v44  ;;  %v404_v27 = vcvt.s32.f32 %v397_v26  ;;  %v487_v9 = vadd.s32 536870912, %v486_v25  ;;  %v415_v3 = vadd.s32 3, %v411_v47 }
  0x7c   :  { %v316_v6 = vsel %vm314_vm3, %v1956_v14, %v315_v46  ;;  %v538_v22 = vor.u32 8388608, %v537_v39  ;;  %v542_v23 = vsel %vm541_vm9, %v540_v0, 0  ;;  %v637_v21 = vand.u32 2139095040, %v2101_v53 }
  0x7d   :  { %v320_v41 = vsel %vm313_vm8, %v316_v6, %v319_v10  ;;  %v402_v13 = vand.u32 2147483647, %v401_v11  ;;  %v2435_v35 = vshrl.u32 %v487_v9, 30  ;;  %v544_v18 = vand.u32 31, %v542_v23 }
  0x7e   :  { %v321_v51 = vsel %vm310_vm7, nan, %v320_v41  ;;  %v543_v24 = vshrl.u32 %v542_v23, 5  ;;  %v2439_v8 = vand.u32 3, %v415_v3  ;;  %v2442_v45 = vshll.u32 %v538_v22, 8 }
  0x7f   :  { %v405_v31 = vmul.f32 %v404_v27, %v402_v13  ;;  %v489_v29 = vshll.u32 %v2435_v35, 30  ;;  %1779 = vst [vmem:[#allocation5 + $0x8] sm:$0xff] %v321_v51  ;;  %v545_v37 = vsub.s32 32, %v544_v18  ;;  %v547_v2 = vshll.u32 %v2064_v32, %v544_v18 }
  0x80   :  { %v550_v28 = vshll.u32 %v2065_v34, %v544_v18  ;;  %v553_v12 = vshll.u32 %v2066_v36, %v544_v18  ;;  %v556_v19 = vshll.u32 %v2067_v38, %v544_v18  ;;  %v638_v14 = vshrl.u32 %v637_v21, 23 }
  0x81   :  { %v406_v4 = vxor.u32 2147483648, %v405_v31  ;;  %v2444_v5 = vsub.s32 %v486_v25, %v489_v29  ;;  %v548_v42 = vshrl.u32 %v2065_v34, %v545_v37  ;;  %v551_v50 = vshrl.u32 %v2066_v36, %v545_v37 }
  0x82   :  { %v554_v39 = vshrl.u32 %v2067_v38, %v545_v37  ;;  %vm562_vm11 = vcmp.lt.s32.totalorder %v543_v24, 1  ;;  %v546_v7 = vshrl.u32 %v2064_v32, %v545_v37  ;;  %v557_v26 = vshrl.u32 %v2068_v40, %v545_v37 }
  0x83   :  { %v407_v47 = vsel %vm324_vm10, %v406_v4, %v405_v31  ;;  %v492_v15 = vsub.s32 0, %v2444_v5  ;;  %v549_v43 = vor.u32 %v548_v42, %v547_v2  ;;  %v552_v25 = vor.u32 %v551_v50, %v550_v28 }
  0x84   :  { %v410_v0 = vsel %vm2416_vm4, %v2124_v1, %v407_v47  ;;  %v555_v46 = vor.u32 %v554_v39, %v553_v12  ;;  %v558_v10 = vor.u32 %v557_v26, %v556_v19  ;;  %v559_v11 = vshll.u32 %v2068_v40, %v544_v18 }
  0x85   :  { %1959 = vcosq.f32 %v410_v0  ;;  %v1826_v44 = vmin.u32 %v492_v15, %v2444_v5  ;;  %v560_v27 = vshrl.u32 %v2069_v48, %v545_v37  ;;  %vm428_vm10 = vcmp.lt.s32.totalorder %v2135_v17, 0 }
  0x86   :  { %1961 = vsinq.f32 %v410_v0  ;;  %v482_v33 = vadd.s32 %v2397_v16, %v2405_v30  ;;  %v634_v6 = vand.u32 2147483647, %v2101_v53  ;;  %v1833_v3 = vadd.s32 4294967169, %v638_v14 }
  0x87   :  { %v494_v9 = vclz %v1826_v44  ;;  %vm418_vm12 = vcmp.eq.s32.totalorder %v2439_v8, 0  ;;  %v561_v22 = vor.u32 %v560_v27, %v559_v11  ;;  %vm563_vm13 = vcmp.lt.s32.totalorder %v543_v24, 2 }
  0x88   :  { %vm564_vm14 = vcmp.lt.s32.totalorder %v543_v24, 3  ;;  %vm565_vm0 = vcmp.lt.s32.totalorder %v543_v24, 4  ;;  %vm417_vm1 = vcmp.lt.s32.totalorder %v2439_v8, 2  ;;  %v566_v41 = vsel %vm562_vm11, %v546_v7, %v549_v43 }
  0x89   :  { %v1827_v23 = vadd.s32 4294967294, %v494_v9  ;;  %v567_v13 = vsel %vm565_vm0, %v555_v46, 2102212464  ;;  %v570_v51 = vsel %vm562_vm11, %v549_v43, %v552_v25  ;;  %vm414_vm2 = vweird.f32 %v2124_v1 }
  0x8a   :  { %v568_v16 = vsel %vm564_vm14, %v552_v25, %v567_v13  ;;  %v571_v30 = vsel %vm565_vm0, %v558_v10, 920167782  ;;  %v574_v18 = vsel %vm562_vm11, %v552_v25, %v555_v46  ;;  %v575_v21 = vsel %vm565_vm0, %v561_v22, 1326507024 }
  0x8b   :  { %vm1828_vm15 = vcmp.lt.s32.totalorder %v1827_v23, 0  ;;  %v512_v31 = vsub.s32 4, %v2435_v35  ;;  %v572_v29 = vsel %vm564_vm14, %v555_v46, %v571_v30  ;;  %v576_v37 = vsel %vm564_vm14, %v558_v10, %v575_v21 }
  0x8c   :  { %v497_v2 = vsel %vm1828_vm15, 0, %v1827_v23  ;;  %v569_v4 = vsel %vm563_vm13, %v566_v41, %v568_v16  ;;  %v573_v28 = vsel %vm563_vm13, %v570_v51, %v572_v29  ;;  %v577_v12 = vsel %vm563_vm13, %v574_v18, %v576_v37 }
  0x8d   :  { %v498_v42 = vsub.s32 32, %v497_v2  ;;  %v499_v50 = vshll.u32 %v2444_v5, %v497_v2  ;;  %v502_v19 = vsub.s32 4294967266, %v497_v2  ;;  %v644_v14 = vadd.s32 1, %v1833_v3 }
  0x8e   :  { %v2479_v47 = vmul.u32.u64.low %v2442_v45, %v577_v12  ;;  %v2480_v15 = vmul.u32.u64.high %v2442_v45, %v577_v12, %v2479_v47  ;;  %v2483_v39 = vmul.u32.u64.low %v2442_v45, %v573_v28  ;;  %v2484_v0 = vmul.u32.u64.high %v2442_v45, %v573_v28, %v2483_v39 }
  0x8f   :  { %v1960_v7 = vpop.eup %1959  ;;  %vm421_vm3 = vcmp.eq.s32.totalorder %v2439_v8, 2  ;;  %v500_v43 = vshrl.u32 %v482_v33, %v498_v42  ;;  %v503_v24 = vadd.s32 127, %v502_v19  ;;  %vm645_vm4 = vcmp.gt.s32.totalorder %v644_v14, 0 }
  0x90   :  { %v1962_v26 = vpop.eup %1961  ;;  %v422_v44 = vxor.u32 2147483648, %v1960_v7  ;;  %v513_v5 = vsel %vm428_vm10, %v512_v31, %v2435_v35  ;;  %v641_v25 = vand.u32 8388607, %v634_v6  ;;  %v646_v46 = vsel %vm645_vm4, %v644_v14, 0 }
  0x91   :  { %v419_v10 = vxor.u32 2147483648, %v1962_v26  ;;  %v501_v11 = vor.u32 %v500_v43, %v499_v50  ;;  %v504_v27 = vshll.u32 %v503_v24, 23  ;;  %v585_v9 = vmul.u32 %v2442_v45, %v569_v4 }
  0x92   :  { %v423_v3 = vsel %vm421_vm3, %v422_v44, %v1962_v26  ;;  %vm2496_vm5 = vcmp.le.f32.partialorder %v426_v49, 0.7853982  ;;  %vm587_vm6 = vc.u32 %v2480_v15, %v2483_v39  ;;  %v588_v35 = vadd.s32 1, %v2484_v0 }
  0x93   :  { %v420_v22 = vsel %vm418_vm12, %v1960_v7, %v419_v10  ;;  %v505_v23 = vor.u32 4788187, %v504_v27  ;;  %v508_v41 = vcvt.s32.f32 %v501_v11  ;;  %v648_v13 = vand.u32 31, %v646_v46 }
  0x94   :  { %v424_v45 = vsel %vm417_vm1, %v420_v22, %v423_v3  ;;  %v515_v49 = vsel %vm2496_vm5, 0, %v513_v5  ;;  %v589_v51 = vsel %vm587_vm6, %v588_v35, %v2484_v0  ;;  %v642_v16 = vor.u32 8388608, %v641_v25 }
  0x95   :  { %v425_v30 = vsel %vm414_vm2, nan, %v424_v45  ;;  %v506_v18 = vand.u32 2147483647, %v505_v23  ;;  %v590_v21 = vadd.s32 %v589_v51, %v585_v9  ;;  %v649_v31 = vsub.s32 32, %v648_v13 }
  0x96   :  { %v647_v29 = vshrl.u32 %v646_v46, 5  ;;  %v651_v37 = vshll.u32 %v2064_v32, %v648_v13  ;;  %v654_v2 = vshll.u32 %v2065_v34, %v648_v13  ;;  %v660_v8 = vshll.u32 %v2067_v38, %v648_v13  ;;  %1780 = vst [vmem:[#allocation5 + $0x10] sm:$0xff] %v425_v30 }
  0x97   :  { %v509_v4 = vmul.f32 %v508_v41, %v506_v18  ;;  %v591_v28 = vadd.s32 536870912, %v590_v21  ;;  %v652_v12 = vshrl.u32 %v2065_v34, %v649_v31  ;;  %v657_v42 = vshll.u32 %v2066_v36, %v648_v13 }
  0x98   :  { %v655_v1 = vshrl.u32 %v2066_v36, %v649_v31  ;;  %v658_v50 = vshrl.u32 %v2067_v38, %v649_v31  ;;  %v661_v19 = vshrl.u32 %v2068_v40, %v649_v31  ;;  %v663_v14 = vshll.u32 %v2068_v40, %v648_v13 }
  0x99   :  { %v510_v47 = vxor.u32 2147483648, %v509_v4  ;;  %v592_v0 = vshrl.u32 %v591_v28, 30  ;;  %v653_v7 = vor.u32 %v652_v12, %v651_v37  ;;  %v664_v43 = vshrl.u32 %v2069_v48, %v649_v31 }
  0x9a   :  { %v519_v24 = vadd.s32 3, %v515_v49  ;;  %v656_v26 = vor.u32 %v655_v1, %v654_v2  ;;  %v662_v44 = vor.u32 %v661_v19, %v660_v8  ;;  %vm666_vm7 = vcmp.lt.s32.totalorder %v647_v29, 1 }
  0x9b   :  { %v511_v5 = vsel %vm428_vm10, %v510_v47, %v509_v4  ;;  %v593_v25 = vshll.u32 %v592_v0, 30  ;;  %v659_v46 = vor.u32 %v658_v50, %v657_v42  ;;  %vm667_vm8 = vcmp.lt.s32.totalorder %v647_v29, 2 }
  0x9c   :  { %v514_v10 = vsel %vm2496_vm5, %v2135_v17, %v511_v5  ;;  %v665_v11 = vor.u32 %v664_v43, %v663_v14  ;;  %vm668_vm9 = vcmp.lt.s32.totalorder %v647_v29, 3  ;;  %vm669_vm11 = vcmp.lt.s32.totalorder %v647_v29, 4 }
  0x9d   :  { %1963 = vcosq.f32 %v514_v10  ;;  %v2527_v27 = vsub.s32 %v590_v21, %v593_v25  ;;  %v650_v9 = vshrl.u32 %v2064_v32, %v649_v31  ;;  %v674_v3 = vsel %vm666_vm7, %v653_v7, %v656_v26 }
  0x9e   :  { %1965 = vsinq.f32 %v514_v10  ;;  %v671_v35 = vsel %vm669_vm11, %v659_v46, 2102212464  ;;  %v675_v22 = vsel %vm669_vm11, %v662_v44, 920167782  ;;  %v682_v23 = vshll.u32 %v642_v16, 8 }
  0x9f   :  { %v596_v41 = vsub.s32 0, %v2527_v27  ;;  %v616_v13 = vsub.s32 4, %v592_v0  ;;  %v676_v33 = vsel %vm668_vm9, %v659_v46, %v675_v22  ;;  %v520_v45 = vand.u32 3, %v519_v24 }
  0xa0   :  { %v677_v49 = vsel %vm667_vm8, %v674_v3, %v676_v33  ;;  %v678_v51 = vsel %vm666_vm7, %v656_v26, %v659_v46  ;;  %v679_v30 = vsel %vm669_vm11, %v665_v11, 1326507024  ;;  %v670_v21 = vsel %vm666_vm7, %v650_v9, %v653_v7 }
  0xa1   :  { %v1830_v18 = vmin.u32 %v596_v41, %v2527_v27  ;;  %v672_v31 = vsel %vm668_vm9, %v656_v26, %v671_v35  ;;  %v680_v37 = vsel %vm668_vm9, %v662_v44, %v679_v30  ;;  %vm532_vm10 = vcmp.lt.s32.totalorder %v2099_v52, 0 }
  0xa2   :  { %v681_v16 = vsel %vm667_vm8, %v678_v51, %v680_v37  ;;  %v2541_v2 = vmul.u32.u64.low %v682_v23, %v677_v49  ;;  %v2542_v8 = vmul.u32.u64.high %v682_v23, %v677_v49, %v2541_v2  ;;  %v617_v28 = vsel %vm532_vm10, %v616_v13, %v592_v0 }
  0xa3   :  { %v598_v4 = vclz %v1830_v18  ;;  %v738_v12 = vand.u32 2147483647, %v2103_v54  ;;  %v673_v42 = vsel %vm667_vm8, %v670_v21, %v672_v31  ;;  %v741_v19 = vand.u32 2139095040, %v2103_v54 }
  0xa4   :  { %v2548_v1 = vmul.u32.u64.low %v682_v23, %v681_v16  ;;  %v2549_v50 = vmul.u32.u64.high %v682_v23, %v681_v16, %v2548_v1  ;;  %vm518_vm12 = vweird.f32 %v2135_v17  ;;  %vm521_vm13 = vcmp.lt.s32.totalorder %v520_v45, 2 }
  0xa5   :  { %vm2555_vm14 = vcmp.le.f32.partialorder %v530_v20, 0.7853982  ;;  %v1831_v47 = vadd.s32 4294967294, %v598_v4  ;;  %vm522_vm0 = vcmp.eq.s32.totalorder %v520_v45, 0  ;;  %vm525_vm1 = vcmp.eq.s32.totalorder %v520_v45, 2 }
  0xa6   :  { %v692_v29 = vadd.s32 1, %v2542_v8  ;;  %v742_v0 = vshrl.u32 %v741_v19, 23  ;;  %v586_v43 = vadd.s32 %v2483_v39, %v2480_v15  ;;  %v619_v24 = vsel %vm2555_vm14, 0, %v617_v28 }
  0xa7   :  { %v1964_v7 = vpop.eup %1963  ;;  %vm1832_vm2 = vcmp.lt.s32.totalorder %v1831_v47, 0  ;;  %v689_v26 = vmul.u32 %v682_v23, %v673_v42  ;;  %vm691_vm15 = vc.u32 %v2549_v50, %v2541_v2  ;;  %v745_v25 = vand.u32 8388607, %v738_v12 }
  0xa8   :  { %v1966_v44 = vpop.eup %1965  ;;  %v526_v20 = vxor.u32 2147483648, %v1964_v7  ;;  %v601_v5 = vsel %vm1832_vm2, 0, %v1831_v47  ;;  %v693_v39 = vsel %vm691_vm15, %v692_v29, %v2542_v8  ;;  %v1837_v3 = vadd.s32 4294967169, %v742_v0 }
  0xa9   :  { %v523_v46 = vxor.u32 2147483648, %v1966_v44  ;;  %v602_v10 = vsub.s32 32, %v601_v5  ;;  %v603_v11 = vshll.u32 %v2527_v27, %v601_v5  ;;  %v606_v9 = vsub.s32 4294967266, %v601_v5 }
  0xaa   :  { %v527_v15 = vsel %vm525_vm1, %v526_v20, %v1966_v44  ;;  %v845_v35 = vand.u32 2139095040, %v2105_v55  ;;  %v694_v13 = vadd.s32 %v693_v39, %v689_v26  ;;  %v623_v49 = vadd.s32 3, %v619_v24 }
  0xab   :  { %v524_v22 = vsel %vm522_vm0, %v1964_v7, %v523_v46  ;;  %v604_v23 = vshrl.u32 %v586_v43, %v602_v10  ;;  %v607_v41 = vadd.s32 127, %v606_v9  ;;  %v748_v51 = vadd.s32 1, %v1837_v3 }
  0xac   :  { %v528_v33 = vsel %vm521_vm13, %v524_v22, %v527_v15  ;;  %v842_v30 = vand.u32 2147483647, %v2105_v55  ;;  %v695_v31 = vadd.s32 536870912, %v694_v13  ;;  %v746_v37 = vor.u32 8388608, %v745_v25 }
  0xad   :  { %v529_v27 = vsel %vm518_vm12, nan, %v528_v33  ;;  %v605_v18 = vor.u32 %v604_v23, %v603_v11  ;;  %v608_v21 = vshll.u32 %v607_v41, 23  ;;  %vm749_vm3 = vcmp.gt.s32.totalorder %v748_v51, 0 }
  0xae   :  { %v846_v16 = vshrl.u32 %v845_v35, 23  ;;  %1781 = vst [vmem:[#allocation5 + $0x18] sm:$0xff] %v529_v27  ;;  %v2576_v28 = vshrl.u32 %v695_v31, 30  ;;  %v750_v45 = vsel %vm749_vm3, %v748_v51, 0  ;;  %v2578_v19 = vand.u32 3, %v623_v49 }
  0xaf   :  { %v609_v8 = vor.u32 4788187, %v608_v21  ;;  %v612_v4 = vcvt.s32.f32 %v605_v18  ;;  %v752_v42 = vand.u32 31, %v750_v45  ;;  %v2583_v17 = vand.u32 8388607, %v842_v30 }
  0xb0   :  { %v697_v47 = vshll.u32 %v2576_v28, 30  ;;  %v690_v29 = vadd.s32 %v2541_v2, %v2549_v50  ;;  %v2586_v7 = vshll.u32 %v746_v37, 8  ;;  %v1841_v43 = vadd.s32 4294967169, %v846_v16 }
  0xb1   :  { %v610_v1 = vand.u32 2147483647, %v609_v8  ;;  %v753_v0 = vsub.s32 32, %v752_v42  ;;  %v755_v44 = vshll.u32 %v2064_v32, %v752_v42  ;;  %v758_v20 = vshll.u32 %v2065_v34, %v752_v42 }
  0xb2   :  { %v2588_v26 = vsub.s32 %v694_v13, %v697_v47  ;;  %v761_v46 = vshll.u32 %v2066_v36, %v752_v42  ;;  %v764_v10 = vshll.u32 %v2067_v38, %v752_v42  ;;  %v751_v11 = vshrl.u32 %v750_v45, 5 }
  0xb3   :  { %v613_v24 = vmul.f32 %v612_v4, %v610_v1  ;;  %v756_v5 = vshrl.u32 %v2065_v34, %v753_v0  ;;  %v759_v25 = vshrl.u32 %v2066_v36, %v753_v0  ;;  %v762_v9 = vshrl.u32 %v2067_v38, %v753_v0 }
  0xb4   :  { %v700_v50 = vsub.s32 0, %v2588_v26  ;;  %v754_v15 = vshrl.u32 %v2064_v32, %v753_v0  ;;  %v765_v39 = vshrl.u32 %v2068_v40, %v753_v0  ;;  %v767_v3 = vshll.u32 %v2068_v40, %v752_v42 }
  0xb5   :  { %v614_v2 = vxor.u32 2147483648, %v613_v24  ;;  %v850_v35 = vor.u32 8388608, %v2583_v17  ;;  %v757_v41 = vor.u32 %v756_v5, %v755_v44  ;;  %v760_v13 = vor.u32 %v759_v25, %v758_v20 }
  0xb6   :  { %v1834_v23 = vmin.u32 %v700_v50, %v2588_v26  ;;  %v763_v49 = vor.u32 %v762_v9, %v761_v46  ;;  %v766_v51 = vor.u32 %v765_v39, %v764_v10  ;;  %v768_v27 = vshrl.u32 %v2069_v48, %v753_v0 }
  0xb7   :  { %v615_v22 = vsel %vm532_vm10, %v614_v2, %v613_v24  ;;  %vm636_vm4 = vcmp.lt.s32.totalorder %v2101_v53, 0  ;;  %vm770_vm5 = vcmp.lt.s32.totalorder %v751_v11, 1  ;;  %v852_v21 = vadd.s32 1, %v1841_v43 }
  0xb8   :  { %v618_v33 = vsel %vm2555_vm14, %v2099_v52, %v615_v22  ;;  %v702_v18 = vclz %v1834_v23  ;;  %v720_v31 = vsub.s32 4, %v2576_v28  ;;  %v769_v37 = vor.u32 %v768_v27, %v767_v3 }
  0xb9   :  { %1967 = vcosq.f32 %v618_v33  ;;  %vm771_vm6 = vcmp.lt.s32.totalorder %v751_v11, 2  ;;  %vm772_vm7 = vcmp.lt.s32.totalorder %v751_v11, 3  ;;  %vm773_vm8 = vcmp.lt.s32.totalorder %v751_v11, 4 }
  0xba   :  { %1969 = vsinq.f32 %v618_v33  ;;  %v1835_v16 = vadd.s32 4294967294, %v702_v18  ;;  %v774_v14 = vsel %vm770_vm5, %v754_v15, %v757_v41  ;;  %v775_v8 = vsel %vm773_vm8, %v763_v49, 2102212464 }
  0xbb   :  { %v778_v4 = vsel %vm770_vm5, %v757_v41, %v760_v13  ;;  %v779_v45 = vsel %vm773_vm8, %v766_v51, 920167782  ;;  %v782_v42 = vsel %vm770_vm5, %v760_v13, %v763_v49  ;;  %vm2613_vm9 = vcmp.le.f32.partialorder %v634_v6, 0.7853982 }
  0xbc   :  { %vm1836_vm11 = vcmp.lt.s32.totalorder %v1835_v16, 0  ;;  %v776_v47 = vsel %vm772_vm7, %v760_v13, %v775_v8  ;;  %v780_v17 = vsel %vm772_vm7, %v763_v49, %v779_v45  ;;  %v783_v0 = vsel %vm773_vm8, %v769_v37, 1326507024 }
  0xbd   :  { %vm622_vm10 = vweird.f32 %v2099_v52  ;;  %v705_v43 = vsel %vm1836_vm11, 0, %v1835_v16  ;;  %v777_v24 = vsel %vm771_vm6, %v774_v14, %v776_v47  ;;  %v781_v44 = vsel %vm771_vm6, %v778_v4, %v780_v17 }
  0xbe   :  { %v784_v20 = vsel %vm772_vm7, %v766_v51, %v783_v0  ;;  %v706_v5 = vsub.s32 32, %v705_v43  ;;  %v707_v6 = vshll.u32 %v2588_v26, %v705_v43  ;;  %v710_v25 = vsub.s32 4294967266, %v705_v43 }
  0xbf   :  { %v785_v46 = vsel %vm771_vm6, %v782_v42, %v784_v20  ;;  %v2630_v50 = vmul.u32.u64.low %v2586_v7, %v781_v44  ;;  %v2631_v9 = vmul.u32.u64.high %v2586_v7, %v781_v44, %v2630_v50  ;;  %vm625_vm12 = vcmp.lt.s32.totalorder %v2578_v19, 2 }
  0xc0   :  { %v2626_v10 = vmul.u32.u64.low %v2586_v7, %v785_v46  ;;  %v2627_v2 = vmul.u32.u64.high %v2586_v7, %v785_v46, %v2626_v10  ;;  %v708_v15 = vshrl.u32 %v690_v29, %v706_v5  ;;  %v711_v39 = vadd.s32 127, %v710_v25 }
  0xc1   :  { %vm853_vm13 = vcmp.gt.s32.totalorder %v852_v21, 0  ;;  %vm626_vm14 = vcmp.eq.s32.totalorder %v2578_v19, 0  ;;  %vm629_vm0 = vcmp.eq.s32.totalorder %v2578_v19, 2  ;;  %v721_v26 = vsel %vm636_vm4, %v720_v31, %v2576_v28 }
  0xc2   :  { %v854_v11 = vsel %vm853_vm13, %v852_v21, 0  ;;  %v709_v22 = vor.u32 %v708_v15, %v707_v6  ;;  %v712_v23 = vshll.u32 %v711_v39, 23  ;;  %v793_v41 = vmul.u32 %v2586_v7, %v777_v24 }
  0xc3   :  { %v1968_v3 = vpop.eup %1967  ;;  %v856_v13 = vand.u32 31, %v854_v11  ;;  %vm795_vm1 = vc.u32 %v2627_v2, %v2630_v50  ;;  %v796_v29 = vadd.s32 1, %v2631_v9  ;;  %v2644_v51 = vshll.u32 %v850_v35, 8 }
  0xc4   :  { %v1970_v33 = vpop.eup %1969  ;;  %v630_v49 = vxor.u32 2147483648, %v1968_v3  ;;  %v713_v18 = vor.u32 4788187, %v712_v23  ;;  %v716_v37 = vcvt.s32.f32 %v709_v22  ;;  %v723_v7 = vsel %vm2613_vm9, 0, %v721_v26 }
  0xc5   :  { %v627_v27 = vxor.u32 2147483648, %v1970_v33  ;;  %v857_v28 = vsub.s32 32, %v856_v13  ;;  %v797_v31 = vsel %vm795_vm1, %v796_v29, %v2631_v9  ;;  %v946_v16 = vand.u32 2147483647, %v2107_v56 }
  0xc6   :  { %v631_v21 = vsel %vm629_vm0, %v630_v49, %v1970_v33  ;;  %v714_v8 = vand.u32 2147483647, %v713_v18  ;;  %v798_v35 = vadd.s32 %v797_v31, %v793_v41  ;;  %v859_v4 = vshll.u32 %v2064_v32, %v856_v13 }
  0xc7   :  { %v628_v14 = vsel %vm626_vm14, %v1968_v3, %v627_v27  ;;  %v860_v42 = vshrl.u32 %v2065_v34, %v857_v28  ;;  %v862_v47 = vshll.u32 %v2065_v34, %v856_v13  ;;  %v863_v17 = vshrl.u32 %v2066_v36, %v857_v28 }
  0xc8   :  { %v632_v45 = vsel %vm625_vm12, %v628_v14, %v631_v21  ;;  %v717_v43 = vmul.f32 %v716_v37, %v714_v8  ;;  %v799_v24 = vadd.s32 536870912, %v798_v35  ;;  %v855_v44 = vshrl.u32 %v854_v11, 5 }
  0xc9   :  { %v633_v0 = vsel %vm622_vm10, nan, %v632_v45  ;;  %v865_v20 = vshll.u32 %v2066_v36, %v856_v13  ;;  %v866_v5 = vshrl.u32 %v2067_v38, %v857_v28  ;;  %v868_v6 = vshll.u32 %v2067_v38, %v856_v13 }
  0xca   :  { %v869_v19 = vshrl.u32 %v2068_v40, %v857_v28  ;;  %1782 = vst [vmem:[#allocation5 + $0x20] sm:$0xff] %v633_v0  ;;  %v718_v25 = vxor.u32 2147483648, %v717_v43  ;;  %v727_v46 = vadd.s32 3, %v723_v7  ;;  %v800_v10 = vshrl.u32 %v799_v24, 30 }
  0xcb   :  { %v871_v9 = vshll.u32 %v2068_v40, %v856_v13  ;;  %vm740_vm2 = vcmp.lt.s32.totalorder %v2103_v54, 0  ;;  %v858_v52 = vshrl.u32 %v2064_v32, %v857_v28  ;;  %v861_v15 = vor.u32 %v860_v42, %v859_v4 }
  0xcc   :  { %v864_v39 = vor.u32 %v863_v17, %v862_v47  ;;  %v872_v26 = vshrl.u32 %v2069_v48, %v857_v28  ;;  %v719_v11 = vsel %vm636_vm4, %v718_v25, %v717_v43  ;;  %v801_v3 = vshll.u32 %v800_v10, 30 }
  0xcd   :  { %v870_v22 = vor.u32 %v869_v19, %v868_v6  ;;  %vm874_vm15 = vcmp.lt.s32.totalorder %v855_v44, 1  ;;  %v722_v23 = vsel %vm2613_vm9, %v2101_v53, %v719_v11  ;;  %v867_v41 = vor.u32 %v866_v5, %v865_v20 }
  0xce   :  { %v873_v13 = vor.u32 %v872_v26, %v871_v9  ;;  %vm877_vm3 = vcmp.lt.s32.totalorder %v855_v44, 4  ;;  %1971 = vcosq.f32 %v722_v23  ;;  %v2675_v33 = vsub.s32 %v798_v35, %v801_v3 }
  0xcf   :  { %vm876_vm5 = vcmp.lt.s32.totalorder %v855_v44, 3  ;;  %v949_v49 = vand.u32 2139095040, %v2107_v56  ;;  %1973 = vsinq.f32 %v722_v23  ;;  %vm875_vm6 = vcmp.lt.s32.totalorder %v855_v44, 2 }
  0xd0   :  { %v879_v29 = vsel %vm877_vm3, %v867_v41, 2102212464  ;;  %v882_v27 = vsel %vm874_vm15, %v861_v15, %v864_v39  ;;  %v728_v18 = vand.u32 3, %v727_v46  ;;  %v804_v37 = vsub.s32 0, %v2675_v33 }
  0xd1   :  { %v824_v1 = vsub.s32 4, %v800_v10  ;;  %v883_v28 = vsel %vm877_vm3, %v870_v22, 920167782  ;;  %v878_v21 = vsel %vm874_vm15, %v858_v52, %v861_v15  ;;  %v886_v31 = vsel %vm874_vm15, %v864_v39, %v867_v41 }
  0xd2   :  { %v884_v7 = vsel %vm876_vm5, %v867_v41, %v883_v28  ;;  %v887_v14 = vsel %vm877_vm3, %v873_v13, 1326507024  ;;  %v1838_v8 = vmin.u32 %v804_v37, %v2675_v33  ;;  %v880_v35 = vsel %vm876_vm5, %v864_v39, %v879_v29 }
  0xd3   :  { %v885_v4 = vsel %vm875_vm6, %v882_v27, %v884_v7  ;;  %v888_v45 = vsel %vm876_vm5, %v870_v22, %v887_v14  ;;  %v950_v0 = vshrl.u32 %v949_v49, 23  ;;  %vm726_vm4 = vweird.f32 %v2101_v53 }
  0xd4   :  { %v889_v42 = vsel %vm875_vm6, %v886_v31, %v888_v45  ;;  %v2692_v47 = vmul.u32.u64.low %v2644_v51, %v885_v4  ;;  %v2693_v17 = vmul.u32.u64.high %v2644_v51, %v885_v4, %v2692_v47  ;;  %vm2699_vm7 = vcmp.le.f32.partialorder %v738_v12, 0.7853982 }
  0xd5   :  { %v806_v24 = vclz %v1838_v8  ;;  %v825_v20 = vsel %vm740_vm2, %v824_v1, %v800_v10  ;;  %v881_v5 = vsel %vm875_vm6, %v878_v21, %v880_v35  ;;  %v1845_v25 = vadd.s32 4294967169, %v950_v0 }
  0xd6   :  { %v2707_v6 = vmul.u32.u64.low %v2644_v51, %v889_v42  ;;  %v2708_v19 = vmul.u32.u64.high %v2644_v51, %v889_v42, %v2707_v6  ;;  %vm729_vm8 = vcmp.lt.s32.totalorder %v728_v18, 2  ;;  %vm730_vm9 = vcmp.eq.s32.totalorder %v728_v18, 0 }
  0xd7   :  { %v1839_v46 = vadd.s32 4294967294, %v806_v24  ;;  %v1053_v9 = vand.u32 2139095040, %v2109_v57  ;;  %vm733_vm11 = vcmp.eq.s32.totalorder %v728_v18, 2  ;;  %v900_v12 = vadd.s32 1, %v2693_v17 }
  0xd8   :  { %v953_v52 = vand.u32 8388607, %v946_v16  ;;  %v956_v15 = vadd.s32 1, %v1845_v25  ;;  %v1972_v10 = vpop.eup %1971  ;;  %v794_v44 = vadd.s32 %v2630_v50, %v2627_v2  ;;  %v827_v39 = vsel %vm2699_vm7, 0, %v825_v20 }
  0xd9   :  { %vm1840_vm10 = vcmp.lt.s32.totalorder %v1839_v46, 0  ;;  %v897_v26 = vmul.u32 %v2644_v51, %v881_v5  ;;  %v1974_v11 = vpop.eup %1973  ;;  %v734_v3 = vxor.u32 2147483648, %v1972_v10  ;;  %vm899_vm12 = vc.u32 %v2708_v19, %v2692_v47 }
  0xda   :  { %v809_v22 = vsel %vm1840_vm10, 0, %v1839_v46  ;;  %v1054_v23 = vshrl.u32 %v1053_v9, 23  ;;  %v731_v41 = vxor.u32 2147483648, %v1974_v11  ;;  %v831_v50 = vadd.s32 3, %v827_v39 }
  0xdb   :  { %v810_v13 = vsub.s32 32, %v809_v22  ;;  %v811_v49 = vshll.u32 %v2675_v33, %v809_v22  ;;  %v814_v29 = vsub.s32 4294967266, %v809_v22  ;;  %v735_v2 = vsel %vm733_vm11, %v734_v3, %v1974_v11 }
  0xdc   :  { %v901_v27 = vsel %vm899_vm12, %v900_v12, %v2693_v17  ;;  %vm957_vm13 = vcmp.gt.s32.totalorder %v956_v15, 0  ;;  %v732_v51 = vsel %vm730_vm9, %v1972_v10, %v731_v41  ;;  %v1050_v31 = vand.u32 2147483647, %v2109_v57 }
  0xdd   :  { %v812_v37 = vshrl.u32 %v794_v44, %v810_v13  ;;  %v815_v1 = vadd.s32 127, %v814_v29  ;;  %v902_v28 = vadd.s32 %v901_v27, %v897_v26  ;;  %v736_v21 = vsel %vm729_vm8, %v732_v51, %v735_v2 }
  0xde   :  { %v958_v7 = vsel %vm957_vm13, %v956_v15, 0  ;;  %v1849_v14 = vadd.s32 4294967169, %v1054_v23  ;;  %v737_v33 = vsel %vm726_vm4, nan, %v736_v21  ;;  %v2729_v45 = vand.u32 3, %v831_v50 }
  0xdf   :  { %v813_v8 = vor.u32 %v812_v37, %v811_v49  ;;  %v816_v35 = vshll.u32 %v815_v1, 23  ;;  %v903_v4 = vadd.s32 536870912, %v902_v28  ;;  %v960_v42 = vand.u32 31, %v958_v7  ;;  %1783 = vst [vmem:[#allocation5 + $0x28] sm:$0xff] %v737_v33 }
  0xe0   :  { %v954_v18 = vor.u32 8388608, %v953_v52  ;;  %v2733_v20 = vshrl.u32 %v958_v7, 5  ;;  %v2737_v6 = vand.u32 8388607, %v1050_v31  ;;  %v1060_v53 = vadd.s32 1, %v1849_v14 }
  0xe1   :  { %v817_v17 = vor.u32 4788187, %v816_v35  ;;  %v820_v0 = vcvt.s32.f32 %v813_v8  ;;  %v2731_v24 = vshrl.u32 %v903_v4, 30  ;;  %v961_v5 = vsub.s32 32, %v960_v42 }
  0xe2   :  { %v963_v9 = vshll.u32 %v2064_v32, %v960_v42  ;;  %v966_v12 = vshll.u32 %v2065_v34, %v960_v42  ;;  %v969_v52 = vshll.u32 %v2066_v36, %v960_v42  ;;  %v972_v11 = vshll.u32 %v2067_v38, %v960_v42 }
  0xe3   :  { %v818_v25 = vand.u32 2147483647, %v817_v17  ;;  %v905_v46 = vshll.u32 %v2731_v24, 30  ;;  %v964_v15 = vshrl.u32 %v2065_v34, %v961_v5  ;;  %v967_v10 = vshrl.u32 %v2066_v36, %v961_v5 }
  0xe4   :  { %v970_v44 = vshrl.u32 %v2067_v38, %v961_v5  ;;  %v973_v3 = vshrl.u32 %v2068_v40, %v961_v5  ;;  %v898_v22 = vadd.s32 %v2692_v47, %v2708_v19  ;;  %v2752_v23 = vshll.u32 %v954_v18, 8 }
  0xe5   :  { %v821_v39 = vmul.f32 %v820_v0, %v818_v25  ;;  %v2746_v26 = vsub.s32 %v902_v28, %v905_v46  ;;  %v1058_v41 = vor.u32 8388608, %v2737_v6  ;;  %vm1061_vm14 = vcmp.gt.s32.totalorder %v1060_v53, 0 }
  0xe6   :  { %v962_v29 = vshrl.u32 %v2064_v32, %v961_v5  ;;  %v965_v2 = vor.u32 %v964_v15, %v963_v9  ;;  %v968_v50 = vor.u32 %v967_v10, %v966_v12  ;;  %v971_v27 = vor.u32 %v970_v44, %v969_v52 }
  0xe7   :  { %v822_v13 = vxor.u32 2147483648, %v821_v39  ;;  %v908_v49 = vsub.s32 0, %v2746_v26  ;;  %v975_v51 = vshll.u32 %v2068_v40, %v960_v42  ;;  %v976_v37 = vshrl.u32 %v2069_v48, %v961_v5 }
  0xe8   :  { %vm844_vm0 = vcmp.lt.s32.totalorder %v2105_v55, 0  ;;  %v974_v1 = vor.u32 %v973_v3, %v972_v11  ;;  %vm978_vm1 = vcmp.lt.s32.totalorder %v2733_v20, 1  ;;  %vm981_vm15 = vcmp.lt.s32.totalorder %v2733_v20, 4 }
  0xe9   :  { %v823_v47 = vsel %vm740_vm2, %v822_v13, %v821_v39  ;;  %v1842_v19 = vmin.u32 %v908_v49, %v2746_v26  ;;  %v977_v21 = vor.u32 %v976_v37, %v975_v51  ;;  %v1062_v7 = vsel %vm1061_vm14, %v1060_v53, 0 }
  0xea   :  { %v826_v28 = vsel %vm2699_vm7, %v2103_v54, %v823_v47  ;;  %vm980_vm2 = vcmp.lt.s32.totalorder %v2733_v20, 3  ;;  %v982_v33 = vsel %vm978_vm1, %v962_v29, %v965_v2  ;;  %vm979_vm3 = vcmp.lt.s32.totalorder %v2733_v20, 2 }
  0xeb   :  { %1975 = vcosq.f32 %v826_v28  ;;  %v910_v14 = vclz %v1842_v19  ;;  %v983_v8 = vsel %vm981_vm15, %v971_v27, 2102212464  ;;  %v986_v43 = vsel %vm978_vm1, %v965_v2, %v968_v50 }
  0xec   :  { %1977 = vsinq.f32 %v826_v28  ;;  %vm837_vm5 = vcmp.eq.s32.totalorder %v2729_v45, 2  ;;  %v984_v4 = vsel %vm980_vm2, %v968_v50, %v983_v8  ;;  %v987_v42 = vsel %vm981_vm15, %v974_v1, 920167782 }
  0xed   :  { %v1843_v35 = vadd.s32 4294967294, %v910_v14  ;;  %v990_v17 = vsel %vm978_vm1, %v968_v50, %v971_v27  ;;  %vm834_vm6 = vcmp.eq.s32.totalorder %v2729_v45, 0  ;;  %v928_v0 = vsub.s32 4, %v2731_v24 }
  0xee   :  { %v985_v18 = vsel %vm979_vm3, %v982_v33, %v984_v4  ;;  %v988_v5 = vsel %vm980_vm2, %v971_v27, %v987_v42  ;;  %v991_v53 = vsel %vm981_vm15, %v977_v21, 1326507024  ;;  %vm833_vm4 = vcmp.lt.s32.totalorder %v2729_v45, 2 }
  0xef   :  { %vm1844_vm7 = vcmp.lt.s32.totalorder %v1843_v35, 0  ;;  %v989_v25 = vsel %vm979_vm3, %v986_v43, %v988_v5  ;;  %v992_v46 = vsel %vm980_vm2, %v974_v1, %v991_v53  ;;  %v2797_v9 = vshrl.u32 %v1062_v7, 5 }
  0xf0   :  { %vm830_vm8 = vweird.f32 %v2103_v54  ;;  %v913_v12 = vsel %vm1844_vm7, 0, %v1843_v35  ;;  %v993_v15 = vsel %vm979_vm3, %v990_v17, %v992_v46  ;;  %v1064_v3 = vand.u32 31, %v1062_v7 }
  0xf1   :  { %v2803_v10 = vmul.u32.u64.low %v2752_v23, %v989_v25  ;;  %v2804_v52 = vmul.u32.u64.high %v2752_v23, %v989_v25, %v2803_v10  ;;  %v914_v44 = vsub.s32 32, %v913_v12  ;;  %v915_v39 = vshll.u32 %v2746_v26, %v913_v12 }
  0xf2   :  { %v918_v11 = vsub.s32 4294967266, %v913_v12  ;;  %v2811_v13 = vsel %vm844_vm0, %v928_v0, %v2731_v24  ;;  %v2814_v49 = vmul.u32.u64.low %v2752_v23, %v993_v15  ;;  %v2815_v29 = vmul.u32.u64.high %v2752_v23, %v993_v15, %v2814_v49 }
  0xf3   :  { %v1001_v20 = vmul.u32 %v2752_v23, %v985_v18  ;;  %v916_v2 = vshrl.u32 %v898_v22, %v914_v44  ;;  %v1065_v27 = vsub.s32 32, %v1064_v3  ;;  %vm1082_vm9 = vcmp.lt.s32.totalorder %v2797_v9, 1 }
  0xf4   :  { %v919_v50 = vadd.s32 127, %v918_v11  ;;  %v1004_v26 = vadd.s32 1, %v2804_v52  ;;  %v1067_v51 = vshll.u32 %v2064_v32, %v1064_v3  ;;  %v1070_v37 = vshll.u32 %v2065_v34, %v1064_v3 }
  0xf5   :  { %v1073_v24 = vshll.u32 %v2066_v36, %v1064_v3  ;;  %v1976_v47 = vpop.eup %1975  ;;  %vm2825_vm11 = vcmp.le.f32.partialorder %v842_v30, 0.7853982  ;;  %v917_v22 = vor.u32 %v916_v2, %v915_v39  ;;  %v1068_v1 = vshrl.u32 %v2065_v34, %v1065_v27 }
  0xf6   :  { %v920_v23 = vshll.u32 %v919_v50, 23  ;;  %v1076_v28 = vshll.u32 %v2067_v38, %v1064_v3  ;;  %v1978_v21 = vpop.eup %1977  ;;  %v838_v7 = vxor.u32 2147483648, %v1976_v47  ;;  %vm1003_vm10 = vc.u32 %v2815_v29, %v2803_v10 }
  0xf7   :  { %v1066_v14 = vshrl.u32 %v2064_v32, %v1065_v27  ;;  %v1071_v33 = vshrl.u32 %v2066_v36, %v1065_v27  ;;  %v835_v8 = vxor.u32 2147483648, %v1978_v21  ;;  %v924_v43 = vcvt.s32.f32 %v917_v22 }
  0xf8   :  { %v921_v30 = vor.u32 4788187, %v920_v23  ;;  %v1005_v35 = vsel %vm1003_vm10, %v1004_v26, %v2804_v52  ;;  %v839_v4 = vsel %vm837_vm5, %v838_v7, %v1978_v21  ;;  %v1069_v17 = vor.u32 %v1068_v1, %v1067_v51 }
  0xf9   :  { %v1006_v42 = vadd.s32 %v1005_v35, %v1001_v20  ;;  %v1072_v0 = vor.u32 %v1071_v33, %v1070_v37  ;;  %v836_v18 = vsel %vm834_vm6, %v1976_v47, %v835_v8  ;;  %v1074_v53 = vshrl.u32 %v2067_v38, %v1065_v27 }
  0xfa   :  { %v922_v5 = vand.u32 2147483647, %v921_v30  ;;  %v1077_v25 = vshrl.u32 %v2068_v40, %v1065_v27  ;;  %v840_v46 = vsel %vm833_vm4, %v836_v18, %v839_v4  ;;  %v1079_v15 = vshll.u32 %v2068_v40, %v1064_v3 }
  0xfb   :  { %v1007_v12 = vadd.s32 536870912, %v1006_v42  ;;  %v1080_v52 = vshrl.u32 %v2069_v48, %v1065_v27  ;;  %v841_v44 = vsel %vm830_vm8, nan, %v840_v46  ;;  %v1075_v11 = vor.u32 %v1074_v53, %v1073_v24 }
  0xfc   :  { %v925_v39 = vmul.f32 %v924_v43, %v922_v5  ;;  %v1078_v49 = vor.u32 %v1077_v25, %v1076_v28  ;;  %vm1083_vm12 = vcmp.lt.s32.totalorder %v2797_v9, 2  ;;  %vm1084_vm13 = vcmp.lt.s32.totalorder %v2797_v9, 3  ;;  %1784 = vst [vmem:[#allocation5 + $0x30] sm:$0xff] %v841_v44 }
  0xfd   :  { %v1008_v20 = vshrl.u32 %v1007_v12, 30  ;;  %vm1085_vm14 = vcmp.lt.s32.totalorder %v2797_v9, 4  ;;  %v1081_v2 = vor.u32 %v1080_v52, %v1079_v15  ;;  %v1090_v54 = vsel %vm1082_vm9, %v1069_v17, %v1072_v0 }
  0xfe   :  { %v926_v45 = vxor.u32 2147483648, %v925_v39  ;;  %v1087_v3 = vsel %vm1085_vm14, %v1075_v11, 2102212464  ;;  %v931_v50 = vsel %vm2825_vm11, 0, %v2811_v13  ;;  %v1091_v26 = vsel %vm1085_vm14, %v1078_v49, 920167782 }
  0xff   :  { %v1009_v27 = vshll.u32 %v1008_v20, 30  ;;  %v1098_v51 = vshll.u32 %v1058_v41, 8  ;;  %v1086_v24 = vsel %vm1082_vm9, %v1066_v14, %v1069_v17  ;;  %v1088_v47 = vsel %vm1084_vm13, %v1072_v0, %v1087_v3 }
 0x100   :  { %v927_v37 = vsel %vm844_vm0, %v926_v45, %v925_v39  ;;  %v1092_v22 = vsel %vm1084_vm13, %v1075_v11, %v1091_v26  ;;  %v1094_v41 = vsel %vm1082_vm9, %v1072_v0, %v1075_v11  ;;  %v935_v1 = vadd.s32 3, %v931_v50 }
 0x101   :  { %v930_v13 = vsel %vm2825_vm11, %v2105_v55, %v927_v37  ;;  %v1010_v23 = vsub.s32 %v1006_v42, %v1009_v27  ;;  %v1093_v6 = vsel %vm1083_vm12, %v1090_v54, %v1092_v22  ;;  %v1032_v28 = vsub.s32 4, %v1008_v20 }
 0x102   :  { %1979 = vcosq.f32 %v930_v13  ;;  %v1095_v21 = vsel %vm1085_vm14, %v1081_v2, 1326507024  ;;  %v1089_v19 = vsel %vm1083_vm12, %v1086_v24, %v1088_v47  ;;  %vm948_vm0 = vcmp.lt.s32.totalorder %v2107_v56, 0 }
 0x103   :  { %1981 = vsinq.f32 %v930_v13  ;;  %v1012_v7 = vsub.s32 0, %v1010_v23  ;;  %v1096_v14 = vsel %vm1084_vm13, %v1078_v49, %v1095_v21  ;;  %v936_v42 = vand.u32 3, %v935_v1 }
 0x104   :  { %v1097_v33 = vsel %vm1083_vm12, %v1094_v41, %v1096_v14  ;;  %v2885_v8 = vmul.u32.u64.low %v1098_v51, %v1093_v6  ;;  %v2886_v30 = vmul.u32.u64.high %v1098_v51, %v1093_v6, %v2885_v8  ;;  %v1033_v17 = vsel %vm948_vm0, %v1032_v28, %v1008_v20 }
 0x105   :  { %v1846_v43 = vmin.u32 %v1012_v7, %v1010_v23  ;;  %v2889_v35 = vmul.u32.u64.low %v1098_v51, %v1097_v33  ;;  %v2890_v4 = vmul.u32.u64.high %v1098_v51, %v1097_v33, %v2889_v35  ;;  %v1157_v0 = vand.u32 2139095040, %v2111_v58 }
 0x106   :  { %v1105_v5 = vmul.u32 %v1098_v51, %v1089_v19  ;;  %vm2897_vm1 = vcmp.le.f32.partialorder %v946_v16, 0.7853982  ;;  %v1108_v53 = vadd.s32 1, %v2886_v30  ;;  %vm934_vm15 = vweird.f32 %v2105_v55 }
 0x107   :  { %v1014_v18 = vclz %v1846_v43  ;;  %v1158_v25 = vshrl.u32 %v1157_v0, 23  ;;  %v1035_v12 = vsel %vm2897_vm1, 0, %v1033_v17  ;;  %vm1107_vm2 = vc.u32 %v2890_v4, %v2885_v8 }
 0x108   :  { %vm937_vm3 = vcmp.lt.s32.totalorder %v936_v42, 2  ;;  %v1109_v15 = vsel %vm1107_vm2, %v1108_v53, %v2886_v30  ;;  %v1154_v52 = vand.u32 2147483647, %v2111_v58  ;;  %vm938_vm5 = vcmp.eq.s32.totalorder %v936_v42, 0 }
 0x109   :  { %v1847_v46 = vadd.s32 4294967294, %v1014_v18  ;;  %v1853_v16 = vadd.s32 4294967169, %v1158_v25  ;;  %v1002_v44 = vadd.s32 %v2803_v10, %v2815_v29  ;;  %v1110_v39 = vadd.s32 %v1109_v15, %v1105_v5 }
 0x10a   :  { %vm941_vm4 = vcmp.eq.s32.totalorder %v936_v42, 2  ;;  %v1039_v20 = vadd.s32 3, %v1035_v12  ;;  %v1161_v37 = vand.u32 8388607, %v1154_v52  ;;  %v1261_v41 = vand.u32 2139095040, %v2113_v59 }
 0x10b   :  { %vm1848_vm6 = vcmp.lt.s32.totalorder %v1847_v46, 0  ;;  %v1164_v45 = vadd.s32 1, %v1853_v16  ;;  %v1111_v51 = vadd.s32 536870912, %v1110_v39  ;;  %v1106_v43 = vadd.s32 %v2885_v8, %v2890_v4 }
 0x10c   :  { %v1980_v11 = vpop.eup %1979  ;;  %v1017_v49 = vsel %vm1848_vm6, 0, %v1847_v46  ;;  %v2919_v7 = vand.u32 3, %v1039_v20  ;;  %v1162_v35 = vor.u32 8388608, %v1161_v37  ;;  %v1262_v18 = vshrl.u32 %v1261_v41, 23 }
 0x10d   :  { %v1982_v2 = vpop.eup %1981  ;;  %v942_v3 = vxor.u32 2147483648, %v1980_v11  ;;  %v1018_v54 = vsub.s32 32, %v1017_v49  ;;  %v1019_v50 = vshll.u32 %v1010_v23, %v1017_v49  ;;  %v1022_v27 = vsub.s32 4294967266, %v1017_v49 }
 0x10e   :  { %v939_v26 = vxor.u32 2147483648, %v1982_v2  ;;  %vm1165_vm7 = vcmp.gt.s32.totalorder %v1164_v45, 0  ;;  %v2913_v13 = vshrl.u32 %v1111_v51, 30  ;;  %v1258_v25 = vand.u32 2147483647, %v2113_v59 }
 0x10f   :  { %v943_v24 = vsel %vm941_vm4, %v942_v3, %v1982_v2  ;;  %v1020_v10 = vshrl.u32 %v1002_v44, %v1018_v54  ;;  %v1023_v29 = vadd.s32 127, %v1022_v27  ;;  %v1166_v47 = vsel %vm1165_vm7, %v1164_v45, 0 }
 0x110   :  { %v940_v22 = vsel %vm938_vm5, %v1980_v11, %v939_v26  ;;  %v1168_v6 = vand.u32 31, %v1166_v47  ;;  %v1113_v14 = vshll.u32 %v2913_v13, 30  ;;  %v1167_v12 = vshrl.u32 %v1166_v47, 5 }
 0x111   :  { %v944_v23 = vsel %vm937_vm3, %v940_v22, %v943_v24  ;;  %v1021_v1 = vor.u32 %v1020_v10, %v1019_v50  ;;  %v1024_v28 = vshll.u32 %v1023_v29, 23  ;;  %vm1052_vm8 = vcmp.lt.s32.totalorder %v2109_v57, 0 }
 0x112   :  { %v945_v21 = vsel %vm934_vm15, nan, %v944_v23  ;;  %v1169_v19 = vsub.s32 32, %v1168_v6  ;;  %v2923_v17 = vsub.s32 %v1110_v39, %v1113_v14  ;;  %v1171_v42 = vshll.u32 %v2064_v32, %v1168_v6 }
 0x113   :  { %v1025_v33 = vor.u32 4788187, %v1024_v28  ;;  %v1028_v30 = vcvt.s32.f32 %v1021_v1  ;;  %1785 = vst [vmem:[#allocation5 + $0x38] sm:$0xff] %v945_v21  ;;  %v1174_v5 = vshll.u32 %v2065_v34, %v1168_v6  ;;  %v1177_v8 = vshll.u32 %v2066_v36, %v1168_v6 }
 0x114   :  { %v1172_v0 = vshrl.u32 %v2065_v34, %v1169_v19  ;;  %v1175_v53 = vshrl.u32 %v2066_v36, %v1169_v19  ;;  %v1116_v46 = vsub.s32 0, %v2923_v17  ;;  %v1178_v4 = vshrl.u32 %v2067_v38, %v1169_v19 }
 0x115   :  { %v1026_v55 = vand.u32 2147483647, %v1025_v33  ;;  %v1180_v16 = vshll.u32 %v2067_v38, %v1168_v6  ;;  %v1181_v44 = vshrl.u32 %v2068_v40, %v1169_v19  ;;  %v2935_v39 = vshll.u32 %v1162_v35, 8 }
 0x116   :  { %v1850_v11 = vmin.u32 %v1116_v46, %v2923_v17  ;;  %v1173_v49 = vor.u32 %v1172_v0, %v1171_v42  ;;  %v1183_v20 = vshll.u32 %v2068_v40, %v1168_v6  ;;  %v1857_v45 = vadd.s32 4294967169, %v1262_v18 }
 0x117   :  { %v1029_v15 = vmul.f32 %v1028_v30, %v1026_v55  ;;  %v1176_v3 = vor.u32 %v1175_v53, %v1174_v5  ;;  %v1182_v54 = vor.u32 %v1181_v44, %v1180_v16  ;;  %v1184_v50 = vshrl.u32 %v2069_v48, %v1169_v19 }
 0x118   :  { %v1118_v27 = vclz %v1850_v11  ;;  %v1170_v26 = vshrl.u32 %v2064_v32, %v1169_v19  ;;  %v1179_v51 = vor.u32 %v1178_v4, %v1177_v8  ;;  %vm1186_vm9 = vcmp.lt.s32.totalorder %v1167_v12, 1 }
 0x119   :  { %v1030_v2 = vxor.u32 2147483648, %v1029_v15  ;;  %v1136_v24 = vsub.s32 4, %v2913_v13  ;;  %v1185_v10 = vor.u32 %v1184_v50, %v1183_v20  ;;  %vm1188_vm11 = vcmp.lt.s32.totalorder %v1167_v12, 3 }
 0x11a   :  { %v1851_v47 = vadd.s32 4294967294, %v1118_v27  ;;  %vm1187_vm10 = vcmp.lt.s32.totalorder %v1167_v12, 2  ;;  %vm1189_vm12 = vcmp.lt.s32.totalorder %v1167_v12, 4  ;;  %v1194_v6 = vsel %vm1186_vm9, %v1173_v49, %v1176_v3 }
 0x11b   :  { %v1031_v37 = vsel %vm948_vm0, %v1030_v2, %v1029_v15  ;;  %v1191_v22 = vsel %vm1189_vm12, %v1179_v51, 2102212464  ;;  %v1195_v41 = vsel %vm1189_vm12, %v1182_v54, 920167782  ;;  %v1190_v23 = vsel %vm1186_vm9, %v1170_v26, %v1173_v49 }
 0x11c   :  { %v1034_v29 = vsel %vm2897_vm1, %v2107_v56, %v1031_v37  ;;  %vm1852_vm13 = vcmp.lt.s32.totalorder %v1851_v47, 0  ;;  %v1196_v1 = vsel %vm1188_vm11, %v1179_v51, %v1195_v41  ;;  %v1192_v9 = vsel %vm1188_vm11, %v1176_v3, %v1191_v22 }
 0x11d   :  { %1983 = vcosq.f32 %v1034_v29  ;;  %v1121_v28 = vsel %vm1852_vm13, 0, %v1851_v47  ;;  %v1197_v21 = vsel %vm1187_vm10, %v1194_v6, %v1196_v1  ;;  %v1198_v14 = vsel %vm1186_vm9, %v1176_v3, %v1179_v51 }
 0x11e   :  { %1985 = vsinq.f32 %v1034_v29  ;;  %v1122_v19 = vsub.s32 32, %v1121_v28  ;;  %v1123_v33 = vshll.u32 %v2923_v17, %v1121_v28  ;;  %v1126_v30 = vsub.s32 4294967266, %v1121_v28 }
 0x11f   :  { %v1199_v35 = vsel %vm1189_vm12, %v1185_v10, 1326507024  ;;  %v1137_v42 = vsel %vm1052_vm8, %v1136_v24, %v2913_v13  ;;  %v2963_v18 = vmul.u32.u64.low %v2935_v39, %v1197_v21  ;;  %v2964_v55 = vmul.u32.u64.high %v2935_v39, %v1197_v21, %v2963_v18 }
 0x120   :  { %v1200_v0 = vsel %vm1188_vm11, %v1182_v54, %v1199_v35  ;;  %v1124_v5 = vshrl.u32 %v1106_v43, %v1122_v19  ;;  %v1127_v53 = vadd.s32 127, %v1126_v30  ;;  %v1193_v46 = vsel %vm1187_vm10, %v1190_v23, %v1192_v9 }
 0x121   :  { %v1201_v17 = vsel %vm1187_vm10, %v1198_v14, %v1200_v0  ;;  %vm1038_vm14 = vweird.f32 %v2107_v56  ;;  %v1268_v13 = vadd.s32 1, %v1857_v45  ;;  %vm2976_vm0 = vcmp.le.f32.partialorder %v1050_v31, 0.7853982 }
 0x122   :  { %v2971_v8 = vmul.u32.u64.low %v2935_v39, %v1201_v17  ;;  %v2972_v4 = vmul.u32.u64.high %v2935_v39, %v1201_v17, %v2971_v8  ;;  %v1125_v16 = vor.u32 %v1124_v5, %v1123_v33  ;;  %v1128_v43 = vshll.u32 %v1127_v53, 23 }
 0x123   :  { %v2982_v44 = vand.u32 8388607, %v1258_v25  ;;  %v1139_v12 = vsel %vm2976_vm0, 0, %v1137_v42  ;;  %v1209_v11 = vmul.u32 %v2935_v39, %v1193_v46  ;;  %v1212_v49 = vadd.s32 1, %v2964_v55 }
 0x124   :  { %vm1269_vm1 = vcmp.gt.s32.totalorder %v1268_v13, 0  ;;  %vm1041_vm15 = vcmp.lt.s32.totalorder %v2919_v7, 2  ;;  %v1129_v31 = vor.u32 4788187, %v1128_v43  ;;  %v1132_v20 = vcvt.s32.f32 %v1125_v16 }
 0x125   :  { %v1270_v45 = vsel %vm1269_vm1, %v1268_v13, 0  ;;  %vm1042_vm2 = vcmp.eq.s32.totalorder %v2919_v7, 0  ;;  %vm1045_vm3 = vcmp.eq.s32.totalorder %v2919_v7, 2  ;;  %vm1211_vm5 = vc.u32 %v2972_v4, %v2963_v18 }
 0x126   :  { %v1272_v3 = vand.u32 31, %v1270_v45  ;;  %v1130_v39 = vand.u32 2147483647, %v1129_v31  ;;  %v1143_v27 = vadd.s32 3, %v1139_v12  ;;  %v1213_v26 = vsel %vm1211_vm5, %v1212_v49, %v2964_v55 }
 0x127   :  { %v1984_v2 = vpop.eup %1983  ;;  %v1214_v37 = vadd.s32 %v1213_v26, %v1209_v11  ;;  %v1266_v24 = vor.u32 8388608, %v2982_v44  ;;  %v2995_v22 = vshrl.u32 %v1270_v45, 5  ;;  %v1365_v5 = vand.u32 2139095040, %v2115_v60 }
 0x128   :  { %v1986_v54 = vpop.eup %1985  ;;  %v1046_v50 = vxor.u32 2147483648, %v1984_v2  ;;  %v1273_v10 = vsub.s32 32, %v1272_v3  ;;  %v1133_v47 = vmul.f32 %v1132_v20, %v1130_v39  ;;  %v1275_v6 = vshll.u32 %v2064_v32, %v1272_v3 }
 0x129   :  { %v1043_v51 = vxor.u32 2147483648, %v1986_v54  ;;  %v1215_v23 = vadd.s32 536870912, %v1214_v37  ;;  %v1278_v28 = vshll.u32 %v2065_v34, %v1272_v3  ;;  %v1281_v19 = vshll.u32 %v2066_v36, %v1272_v3 }
 0x12a   :  { %v1047_v29 = vsel %vm1045_vm3, %v1046_v50, %v1986_v54  ;;  %v1276_v1 = vshrl.u32 %v2065_v34, %v1273_v10  ;;  %v1134_v21 = vxor.u32 2147483648, %v1133_v47  ;;  %v1279_v14 = vshrl.u32 %v2066_v36, %v1273_v10 }
 0x12b   :  { %v1044_v41 = vsel %vm1042_vm2, %v1984_v2, %v1043_v51  ;;  %v3008_v30 = vshrl.u32 %v1215_v23, 30  ;;  %v1282_v35 = vshrl.u32 %v2067_v38, %v1273_v10  ;;  %v1284_v42 = vshll.u32 %v2067_v38, %v1272_v3 }
 0x12c   :  { %v1048_v9 = vsel %vm1041_vm15, %v1044_v41, %v1047_v29  ;;  %v1135_v0 = vsel %vm1052_vm8, %v1134_v21, %v1133_v47  ;;  %v1274_v7 = vshrl.u32 %v2064_v32, %v1273_v10  ;;  %v1285_v55 = vshrl.u32 %v2068_v40, %v1273_v10 }
 0x12d   :  { %v1049_v33 = vsel %vm1038_vm14, nan, %v1048_v9  ;;  %v1138_v56 = vsel %vm2976_vm0, %v2109_v57, %v1135_v0  ;;  %v1217_v53 = vshll.u32 %v3008_v30, 30  ;;  %v1277_v46 = vor.u32 %v1276_v1, %v1275_v6 }
 0x12e   :  { %1786 = vst [vmem:[#allocation5 + $0x40] sm:$0xff] %v1049_v33  ;;  %v1287_v17 = vshll.u32 %v2068_v40, %v1272_v3  ;;  %1987 = vcosq.f32 %v1138_v56  ;;  %v1280_v8 = vor.u32 %v1279_v14, %v1278_v28  ;;  %v1286_v13 = vor.u32 %v1285_v55, %v1284_v42 }
 0x12f   :  { %v1288_v16 = vshrl.u32 %v2069_v48, %v1273_v10  ;;  %1989 = vsinq.f32 %v1138_v56  ;;  %v3023_v43 = vsub.s32 %v1214_v37, %v1217_v53  ;;  %v1283_v44 = vor.u32 %v1282_v35, %v1281_v19 }
 0x130   :  { %vm1290_vm6 = vcmp.lt.s32.totalorder %v2995_v22, 1  ;;  %vm1292_vm4 = vcmp.lt.s32.totalorder %v2995_v22, 3  ;;  %vm1293_vm7 = vcmp.lt.s32.totalorder %v2995_v22, 4  ;;  %v1366_v15 = vshrl.u32 %v1365_v5, 23 }
 0x131   :  { %v1289_v12 = vor.u32 %v1288_v16, %v1287_v17  ;;  %v1144_v11 = vand.u32 3, %v1143_v27  ;;  %v1220_v49 = vsub.s32 0, %v3023_v43  ;;  %vm1291_vm8 = vcmp.lt.s32.totalorder %v2995_v22, 2 }
 0x132   :  { %v1295_v31 = vsel %vm1293_vm7, %v1283_v44, 2102212464  ;;  %v1298_v20 = vsel %vm1290_vm6, %v1277_v46, %v1280_v8  ;;  %v1299_v45 = vsel %vm1293_vm7, %v1286_v13, 920167782  ;;  %v1306_v2 = vshll.u32 %v1266_v24, 8 }
 0x133   :  { %v1362_v3 = vand.u32 2147483647, %v2115_v60  ;;  %vm1142_vm9 = vweird.f32 %v2109_v57  ;;  %vm1156_vm11 = vcmp.lt.s32.totalorder %v2111_v58, 0  ;;  %v1854_v54 = vmin.u32 %v1220_v49, %v3023_v43 }
 0x134   :  { %v1294_v50 = vsel %vm1290_vm6, %v1274_v7, %v1277_v46  ;;  %v1296_v39 = vsel %vm1292_vm4, %v1280_v8, %v1295_v31  ;;  %v1300_v27 = vsel %vm1292_vm4, %v1283_v44, %v1299_v45  ;;  %v1302_v51 = vsel %vm1290_vm6, %v1280_v8, %v1283_v44 }
 0x135   :  { %v1301_v26 = vsel %vm1291_vm8, %v1298_v20, %v1300_v27  ;;  %v1303_v37 = vsel %vm1293_vm7, %v1289_v12, 1326507024  ;;  %v1861_v24 = vadd.s32 4294967169, %v1366_v15  ;;  %vm1145_vm10 = vcmp.lt.s32.totalorder %v1144_v11, 2 }
 0x136   :  { %vm1146_vm12 = vcmp.eq.s32.totalorder %v1144_v11, 0  ;;  %vm1149_vm13 = vcmp.eq.s32.totalorder %v1144_v11, 2  ;;  %v1222_v10 = vclz %v1854_v54  ;;  %v1297_v29 = vsel %vm1291_vm8, %v1294_v50, %v1296_v39 }
 0x137   :  { %v1304_v47 = vsel %vm1292_vm4, %v1286_v13, %v1303_v37  ;;  %v3056_v6 = vmul.u32.u64.low %v1306_v2, %v1301_v26  ;;  %v3057_v41 = vmul.u32.u64.high %v1306_v2, %v1301_v26, %v3056_v6  ;;  %v3064_v28 = vand.u32 8388607, %v1362_v3 }
 0x138   :  { %v1855_v23 = vadd.s32 4294967294, %v1222_v10  ;;  %v1305_v1 = vsel %vm1291_vm8, %v1302_v51, %v1304_v47  ;;  %v1372_v9 = vadd.s32 1, %v1861_v24  ;;  %v1988_v21 = vpop.eup %1987  ;;  %v1210_v14 = vadd.s32 %v2963_v18, %v2972_v4 }
 0x139   :  { %v1240_v19 = vsub.s32 4, %v3008_v30  ;;  %v3069_v33 = vmul.u32.u64.low %v1306_v2, %v1305_v1  ;;  %v3070_v35 = vmul.u32.u64.high %v1306_v2, %v1305_v1, %v3069_v33  ;;  %v1990_v42 = vpop.eup %1989  ;;  %v1150_v0 = vxor.u32 2147483648, %v1988_v21 }
 0x13a   :  { %vm1856_vm14 = vcmp.lt.s32.totalorder %v1855_v23, 0  ;;  %v1313_v7 = vmul.u32 %v1306_v2, %v1297_v29  ;;  %vm1373_vm0 = vcmp.gt.s32.totalorder %v1372_v9, 0  ;;  %v1147_v22 = vxor.u32 2147483648, %v1990_v42 }
 0x13b   :  { %v1225_v55 = vsel %vm1856_vm14, 0, %v1855_v23  ;;  %v1316_v5 = vadd.s32 1, %v3057_v41  ;;  %v1374_v56 = vsel %vm1373_vm0, %v1372_v9, 0  ;;  %v1151_v53 = vsel %vm1149_vm13, %v1150_v0, %v1990_v42 }
 0x13c   :  { %v1226_v46 = vsub.s32 32, %v1225_v55  ;;  %v1227_v18 = vshll.u32 %v3023_v43, %v1225_v55  ;;  %v1230_v4 = vsub.s32 4294967266, %v1225_v55  ;;  %v1148_v17 = vsel %vm1146_vm12, %v1988_v21, %v1147_v22 }
 0x13d   :  { %vm3078_vm1 = vcmp.le.f32.partialorder %v1154_v52, 0.7853982  ;;  %v1241_v13 = vsel %vm1156_vm11, %v1240_v19, %v3008_v30  ;;  %vm1315_vm15 = vc.u32 %v3070_v35, %v3056_v6  ;;  %v1152_v16 = vsel %vm1145_vm10, %v1148_v17, %v1151_v53 }
 0x13e   :  { %v1228_v44 = vshrl.u32 %v1210_v14, %v1226_v46  ;;  %v1231_v43 = vadd.s32 127, %v1230_v4  ;;  %v1317_v12 = vsel %vm1315_vm15, %v1316_v5, %v3057_v41  ;;  %v1153_v15 = vsel %vm1142_vm9, nan, %v1152_v16 }
 0x13f   :  { %v1318_v52 = vadd.s32 %v1317_v12, %v1313_v7  ;;  %v3091_v49 = vshrl.u32 %v1374_v56, 5  ;;  %v1376_v31 = vand.u32 31, %v1374_v56  ;;  %v1243_v30 = vsel %vm3078_vm1, 0, %v1241_v13  ;;  %1787 = vst [vmem:[#allocation5 + $0x48] sm:$0xff] %v1153_v15 }
 0x140   :  { %v1229_v20 = vor.u32 %v1228_v44, %v1227_v18  ;;  %v1232_v45 = vshll.u32 %v1231_v43, 23  ;;  %v1370_v2 = vor.u32 8388608, %v3064_v28  ;;  %v1247_v0 = vadd.s32 3, %v1243_v30 }
 0x141   :  { %v1319_v11 = vadd.s32 536870912, %v1318_v52  ;;  %v1377_v54 = vsub.s32 32, %v1376_v31  ;;  %v1379_v50 = vshll.u32 %v2064_v32, %v1376_v31  ;;  %v1382_v39 = vshll.u32 %v2065_v34, %v1376_v31 }
 0x142   :  { %v1233_v57 = vor.u32 4788187, %v1232_v45  ;;  %v1236_v27 = vcvt.s32.f32 %v1229_v20  ;;  %v1385_v26 = vshll.u32 %v2066_v36, %v1376_v31  ;;  %v1388_v51 = vshll.u32 %v2067_v38, %v1376_v31 }
 0x143   :  { %v1320_v37 = vshrl.u32 %v1319_v11, 30  ;;  %v1380_v24 = vshrl.u32 %v2065_v34, %v1377_v54  ;;  %v1383_v10 = vshrl.u32 %v2066_v36, %v1377_v54  ;;  %vm1394_vm2 = vcmp.lt.s32.totalorder %v3091_v49, 1 }
 0x144   :  { %v1234_v29 = vand.u32 2147483647, %v1233_v57  ;;  %v1386_v47 = vshrl.u32 %v2067_v38, %v1377_v54  ;;  %v1389_v41 = vshrl.u32 %v2068_v40, %v1377_v54  ;;  %v1391_v23 = vshll.u32 %v2068_v40, %v1376_v31 }
 0x145   :  { %v1321_v1 = vshll.u32 %v1320_v37, 30  ;;  %v1378_v28 = vshrl.u32 %v2064_v32, %v1377_v54  ;;  %v1381_v9 = vor.u32 %v1380_v24, %v1379_v50  ;;  %v1384_v21 = vor.u32 %v1383_v10, %v1382_v39 }
 0x146   :  { %v1237_v14 = vmul.f32 %v1236_v27, %v1234_v29  ;;  %v1387_v19 = vor.u32 %v1386_v47, %v1385_v26  ;;  %v1390_v33 = vor.u32 %v1389_v41, %v1388_v51  ;;  %v1392_v42 = vshrl.u32 %v2069_v48, %v1377_v54 }
 0x147   :  { %v3108_v7 = vsub.s32 %v1318_v52, %v1321_v1  ;;  %vm1397_vm3 = vcmp.lt.s32.totalorder %v3091_v49, 4  ;;  %vm1396_vm5 = vcmp.lt.s32.totalorder %v3091_v49, 3  ;;  %vm1395_vm6 = vcmp.lt.s32.totalorder %v3091_v49, 2 }
 0x148   :  { %v1238_v22 = vxor.u32 2147483648, %v1237_v14  ;;  %v1393_v55 = vor.u32 %v1392_v42, %v1391_v23  ;;  %v1399_v5 = vsel %vm1397_vm3, %v1387_v19, 2102212464  ;;  %v1402_v53 = vsel %vm1394_vm2, %v1381_v9, %v1384_v21 }
 0x149   :  { %v1324_v56 = vsub.s32 0, %v3108_v7  ;;  %v1410_v46 = vshll.u32 %v1370_v2, 8  ;;  %v1344_v4 = vsub.s32 4, %v1320_v37  ;;  %v1398_v17 = vsel %vm1394_vm2, %v1378_v28, %v1381_v9 }
 0x14a   :  { %v1239_v18 = vsel %vm1156_vm11, %v1238_v22, %v1237_v14  ;;  %v1403_v13 = vsel %vm1397_vm3, %v1390_v33, 920167782  ;;  %v1400_v43 = vsel %vm1396_vm5, %v1384_v21, %v1399_v5  ;;  %v1406_v52 = vsel %vm1394_vm2, %v1384_v21, %v1387_v19 }
 0x14b   :  { %v1242_v16 = vsel %vm3078_vm1, %v2111_v58, %v1239_v18  ;;  %v1858_v44 = vmin.u32 %v1324_v56, %v3108_v7  ;;  %v1404_v12 = vsel %vm1396_vm5, %v1387_v19, %v1403_v13  ;;  %v1407_v31 = vsel %vm1397_vm3, %v1393_v55, 1326507024 }
 0x14c   :  { %1991 = vcosq.f32 %v1242_v16  ;;  %v1405_v15 = vsel %vm1395_vm6, %v1402_v53, %v1404_v12  ;;  %vm1260_vm4 = vcmp.lt.s32.totalorder %v2113_v59, 0  ;;  %v1408_v45 = vsel %vm1396_vm5, %v1390_v33, %v1407_v31 }
 0x14d   :  { %1993 = vsinq.f32 %v1242_v16  ;;  %v1326_v8 = vclz %v1858_v44  ;;  %v1345_v20 = vsel %vm1260_vm4, %v1344_v4, %v1320_v37  ;;  %v1401_v54 = vsel %vm1395_vm6, %v1398_v17, %v1400_v43 }
 0x14e   :  { %v3143_v30 = vmul.u32.u64.low %v1410_v46, %v1405_v15  ;;  %v3144_v2 = vmul.u32.u64.high %v1410_v46, %v1405_v15, %v3143_v30  ;;  %v1409_v50 = vsel %vm1395_vm6, %v1406_v52, %v1408_v45  ;;  %v1469_v39 = vand.u32 2139095040, %v2117_v61 }
 0x14f   :  { %v1859_v11 = vadd.s32 4294967294, %v1326_v8  ;;  %v1248_v57 = vand.u32 3, %v1247_v0  ;;  %vm3153_vm7 = vcmp.le.f32.partialorder %v1258_v25, 0.7853982  ;;  %v1314_v37 = vadd.s32 %v3056_v6, %v3070_v35 }
 0x150   :  { %v3157_v26 = vmul.u32.u64.low %v1410_v46, %v1409_v50  ;;  %v3158_v51 = vmul.u32.u64.high %v1410_v46, %v1409_v50, %v3157_v26  ;;  %v1466_v24 = vand.u32 2147483647, %v2117_v61  ;;  %v1470_v49 = vshrl.u32 %v1469_v39, 23 }
 0x151   :  { %vm1860_vm8 = vcmp.lt.s32.totalorder %v1859_v11, 0  ;;  %v1347_v29 = vsel %vm3153_vm7, 0, %v1345_v20  ;;  %v1417_v47 = vmul.u32 %v1410_v46, %v1401_v54  ;;  %v1420_v25 = vadd.s32 1, %v3144_v2 }
 0x152   :  { %v1329_v10 = vsel %vm1860_vm8, 0, %v1859_v11  ;;  %v1865_v28 = vadd.s32 4294967169, %v1470_v49  ;;  %vm1250_vm9 = vcmp.eq.s32.totalorder %v1248_v57, 0  ;;  %vm1419_vm11 = vc.u32 %v3158_v51, %v3143_v30 }
 0x153   :  { %v1330_v41 = vsub.s32 32, %v1329_v10  ;;  %v1331_v23 = vshll.u32 %v3108_v7, %v1329_v10  ;;  %v1334_v1 = vsub.s32 4294967266, %v1329_v10  ;;  %v1421_v9 = vsel %vm1419_vm11, %v1420_v25, %v3144_v2 }
 0x154   :  { %v1476_v21 = vadd.s32 1, %v1865_v28  ;;  %vm1253_vm10 = vcmp.eq.s32.totalorder %v1248_v57, 2  ;;  %v1351_v19 = vadd.s32 3, %v1347_v29  ;;  %v1422_v33 = vadd.s32 %v1421_v9, %v1417_v47 }
 0x155   :  { %v1332_v6 = vshrl.u32 %v1314_v37, %v1330_v41  ;;  %v1335_v35 = vadd.s32 127, %v1334_v1  ;;  %v1473_v42 = vand.u32 8388607, %v1466_v24  ;;  %vm1249_vm13 = vcmp.lt.s32.totalorder %v1248_v57, 2 }
 0x156   :  { %v1992_v14 = vpop.eup %1991  ;;  %vm1477_vm12 = vcmp.gt.s32.totalorder %v1476_v21, 0  ;;  %v1423_v56 = vadd.s32 536870912, %v1422_v33  ;;  %vm1246_vm14 = vweird.f32 %v2111_v58  ;;  %v3175_v15 = vand.u32 3, %v1351_v19 }
 0x157   :  { %v1994_v0 = vpop.eup %1993  ;;  %v1254_v22 = vxor.u32 2147483648, %v1992_v14  ;;  %v1333_v7 = vor.u32 %v1332_v6, %v1331_v23  ;;  %v1336_v55 = vshll.u32 %v1335_v35, 23  ;;  %v1478_v53 = vsel %vm1477_vm12, %v1476_v21, 0 }
 0x158   :  { %v1251_v5 = vxor.u32 2147483648, %v1994_v0  ;;  %v3173_v13 = vshrl.u32 %v1423_v56, 30  ;;  %v1474_v16 = vor.u32 8388608, %v1473_v42  ;;  %v1480_v44 = vand.u32 31, %v1478_v53 }
 0x159   :  { %v1255_v46 = vsel %vm1253_vm10, %v1254_v22, %v1994_v0  ;;  %v1337_v18 = vor.u32 4788187, %v1336_v55  ;;  %v1340_v4 = vcvt.s32.f32 %v1333_v7  ;;  %v1573_v52 = vand.u32 2139095040, %v2119_v62 }
 0x15a   :  { %v1252_v17 = vsel %vm1250_vm9, %v1992_v14, %v1251_v5  ;;  %v1425_v8 = vshll.u32 %v3173_v13, 30  ;;  %v1479_v20 = vshrl.u32 %v1478_v53, 5  ;;  %v1481_v58 = vsub.s32 32, %v1480_v44 }
 0x15b   :  { %v1256_v43 = vsel %vm1249_vm13, %v1252_v17, %v1255_v46  ;;  %v1338_v12 = vand.u32 2147483647, %v1337_v18  ;;  %v1418_v2 = vadd.s32 %v3143_v30, %v3158_v51  ;;  %v1483_v11 = vshll.u32 %v2064_v32, %v1480_v44 }
 0x15c   :  { %v1257_v31 = vsel %vm1246_vm14, nan, %v1256_v43  ;;  %v1570_v54 = vand.u32 2147483647, %v2119_v62  ;;  %v3182_v50 = vsub.s32 %v1422_v33, %v1425_v8  ;;  %v1484_v39 = vshrl.u32 %v2065_v34, %v1481_v58 }
 0x15d   :  { %v1341_v45 = vmul.f32 %v1340_v4, %v1338_v12  ;;  %1788 = vst [vmem:[#allocation5 + $0x50] sm:$0xff] %v1257_v31  ;;  %v1486_v57 = vshll.u32 %v2065_v34, %v1480_v44  ;;  %v3186_v26 = vshll.u32 %v1474_v16, 8  ;;  %v1487_v49 = vshrl.u32 %v2066_v36, %v1481_v58 }
 0x15e   :  { %v1489_v10 = vshll.u32 %v2066_v36, %v1480_v44  ;;  %v1490_v30 = vshrl.u32 %v2067_v38, %v1481_v58  ;;  %v1428_v51 = vsub.s32 0, %v3182_v50  ;;  %v1492_v29 = vshll.u32 %v2067_v38, %v1480_v44 }
 0x15f   :  { %v1342_v37 = vxor.u32 2147483648, %v1341_v45  ;;  %vm1498_vm0 = vcmp.lt.s32.totalorder %v1479_v20, 1  ;;  %v1574_v47 = vshrl.u32 %v1573_v52, 23  ;;  %v1482_v41 = vshrl.u32 %v2064_v32, %v1481_v58 }
 0x160   :  { %v1485_v23 = vor.u32 %v1484_v39, %v1483_v11  ;;  %v1493_v1 = vshrl.u32 %v2068_v40, %v1481_v58  ;;  %v1862_v6 = vmin.u32 %v1428_v51, %v3182_v50  ;;  %v1488_v35 = vor.u32 %v1487_v49, %v1486_v57 }
 0x161   :  { %v1343_v25 = vsel %vm1260_vm4, %v1342_v37, %v1341_v45  ;;  %v1495_v9 = vshll.u32 %v2068_v40, %v1480_v44  ;;  %v1491_v21 = vor.u32 %v1490_v30, %v1489_v10  ;;  %v1496_v19 = vshrl.u32 %v2069_v48, %v1481_v58 }
 0x162   :  { %v1346_v28 = vsel %vm3153_vm7, %v2113_v59, %v1343_v25  ;;  %v1494_v14 = vor.u32 %v1493_v1, %v1492_v29  ;;  %vm1364_vm1 = vcmp.lt.s32.totalorder %v2115_v60, 0  ;;  %v1430_v33 = vclz %v1862_v6 }
 0x163   :  { %1995 = vcosq.f32 %v1346_v28  ;;  %vm1500_vm15 = vcmp.lt.s32.totalorder %v1479_v20, 3  ;;  %v1869_v42 = vadd.s32 4294967169, %v1574_v47  ;;  %v1497_v0 = vor.u32 %v1496_v19, %v1495_v9 }
 0x164   :  { %1997 = vsinq.f32 %v1346_v28  ;;  %vm1499_vm2 = vcmp.lt.s32.totalorder %v1479_v20, 2  ;;  %vm1501_vm3 = vcmp.lt.s32.totalorder %v1479_v20, 4  ;;  %v1502_v27 = vsel %vm1498_vm0, %v1482_v41, %v1485_v23 }
 0x165   :  { %v1863_v22 = vadd.s32 4294967294, %v1430_v33  ;;  %v1503_v7 = vsel %vm1501_vm3, %v1491_v21, 2102212464  ;;  %v1506_v55 = vsel %vm1498_vm0, %v1485_v23, %v1488_v35  ;;  %v1507_v5 = vsel %vm1501_vm3, %v1494_v14, 920167782 }
 0x166   :  { %v1504_v56 = vsel %vm1500_vm15, %v1488_v35, %v1503_v7  ;;  %v1508_v53 = vsel %vm1500_vm15, %v1491_v21, %v1507_v5  ;;  %v1510_v46 = vsel %vm1498_vm0, %v1488_v35, %v1491_v21  ;;  %v1511_v18 = vsel %vm1501_vm3, %v1497_v0, 1326507024 }
 0x167   :  { %vm1350_vm5 = vweird.f32 %v2113_v59  ;;  %vm1864_vm6 = vcmp.lt.s32.totalorder %v1863_v22, 0  ;;  %v1448_v4 = vsub.s32 4, %v3173_v13  ;;  %v1509_v17 = vsel %vm1499_vm2, %v1506_v55, %v1508_v53 }
 0x168   :  { %v1512_v16 = vsel %vm1500_vm15, %v1494_v14, %v1511_v18  ;;  %v1433_v44 = vsel %vm1864_vm6, 0, %v1863_v22  ;;  %v3215_v12 = vmul.u32.u64.low %v3186_v26, %v1509_v17  ;;  %v3216_v52 = vmul.u32.u64.high %v3186_v26, %v1509_v17, %v3215_v12 }
 0x169   :  { %v1513_v43 = vsel %vm1499_vm2, %v1510_v46, %v1512_v16  ;;  %v1434_v31 = vsub.s32 32, %v1433_v44  ;;  %v1435_v8 = vshll.u32 %v3182_v50, %v1433_v44  ;;  %v1438_v58 = vsub.s32 4294967266, %v1433_v44 }
 0x16a   :  { %v1505_v45 = vsel %vm1499_vm2, %v1502_v27, %v1504_v56  ;;  %vm1354_vm4 = vcmp.eq.s32.totalorder %v3175_v15, 0  ;;  %v3223_v11 = vmul.u32.u64.low %v3186_v26, %v1513_v43  ;;  %v3224_v39 = vmul.u32.u64.high %v3186_v26, %v1513_v43, %v3223_v11 }
 0x16b   :  { %v1580_v57 = vadd.s32 1, %v1869_v42  ;;  %vm1357_vm7 = vcmp.eq.s32.totalorder %v3175_v15, 2  ;;  %v1436_v37 = vshrl.u32 %v1418_v2, %v1434_v31  ;;  %v1439_v49 = vadd.s32 127, %v1438_v58 }
 0x16c   :  { %v3229_v10 = vand.u32 8388607, %v1570_v54  ;;  %v1449_v20 = vsel %vm1364_vm1, %v1448_v4, %v3173_v13  ;;  %v1521_v50 = vmul.u32 %v3186_v26, %v1505_v45  ;;  %v1524_v51 = vadd.s32 1, %v3216_v52 }
 0x16d   :  { %v1996_v30 = vpop.eup %1995  ;;  %vm1581_vm8 = vcmp.gt.s32.totalorder %v1580_v57, 0  ;;  %v1437_v25 = vor.u32 %v1436_v37, %v1435_v8  ;;  %v1440_v41 = vshll.u32 %v1439_v49, 23  ;;  %vm1353_vm9 = vcmp.lt.s32.totalorder %v3175_v15, 2 }
 0x16e   :  { %v1998_v29 = vpop.eup %1997  ;;  %v1358_v47 = vxor.u32 2147483648, %v1996_v30  ;;  %v1582_v2 = vsel %vm1581_vm8, %v1580_v57, 0  ;;  %vm3239_vm11 = vcmp.le.f32.partialorder %v1362_v3, 0.7853982  ;;  %vm1523_vm10 = vc.u32 %v3224_v39, %v3215_v12 }
 0x16f   :  { %v1355_v23 = vxor.u32 2147483648, %v1998_v29  ;;  %v1441_v26 = vor.u32 4788187, %v1440_v41  ;;  %v1444_v28 = vcvt.s32.f32 %v1437_v25  ;;  %v1525_v6 = vsel %vm1523_vm10, %v1524_v51, %v3216_v52 }
 0x170   :  { %v1359_v13 = vsel %vm1357_vm7, %v1358_v47, %v1998_v29  ;;  %v1451_v9 = vsel %vm3239_vm11, 0, %v1449_v20  ;;  %v1526_v3 = vadd.s32 %v1525_v6, %v1521_v50  ;;  %v1584_v21 = vand.u32 31, %v1582_v2 }
 0x171   :  { %v1356_v35 = vsel %vm1354_vm4, %v1996_v30, %v1355_v23  ;;  %v1442_v19 = vand.u32 2147483647, %v1441_v26  ;;  %v1578_v33 = vor.u32 8388608, %v3229_v10  ;;  %v1583_v42 = vshrl.u32 %v1582_v2, 5 }
 0x172   :  { %v1360_v14 = vsel %vm1353_vm9, %v1356_v35, %v1359_v13  ;;  %v1527_v27 = vadd.s32 536870912, %v1526_v3  ;;  %v1585_v22 = vsub.s32 32, %v1584_v21  ;;  %v1587_v7 = vshll.u32 %v2064_v32, %v1584_v21 }
 0x173   :  { %v1361_v0 = vsel %vm1350_vm5, nan, %v1360_v14  ;;  %v1445_v55 = vmul.f32 %v1444_v28, %v1442_v19  ;;  %v1455_v15 = vadd.s32 3, %v1451_v9  ;;  %v1590_v5 = vshll.u32 %v2065_v34, %v1584_v21 }
 0x174   :  { %v1596_v56 = vshll.u32 %v2067_v38, %v1584_v21  ;;  %1789 = vst [vmem:[#allocation5 + $0x58] sm:$0xff] %v1361_v0  ;;  %v3258_v53 = vshrl.u32 %v1527_v27, 30  ;;  %v1588_v46 = vshrl.u32 %v2065_v34, %v1585_v22  ;;  %v1591_v18 = vshrl.u32 %v2066_v36, %v1585_v22 }
 0x175   :  { %v1593_v59 = vshll.u32 %v2066_v36, %v1584_v21  ;;  %v1446_v4 = vxor.u32 2147483648, %v1445_v55  ;;  %v1594_v17 = vshrl.u32 %v2067_v38, %v1585_v22  ;;  %v1597_v16 = vshrl.u32 %v2068_v40, %v1585_v22 }
 0x176   :  { %v1599_v44 = vshll.u32 %v2068_v40, %v1584_v21  ;;  %v1529_v43 = vshll.u32 %v3258_v53, 30  ;;  %v1586_v52 = vshrl.u32 %v2064_v32, %v1585_v22  ;;  %v1589_v31 = vor.u32 %v1588_v46, %v1587_v7 }
 0x177   :  { %vm1602_vm12 = vcmp.lt.s32.totalorder %v1583_v42, 1  ;;  %v1447_v8 = vsel %vm1364_vm1, %v1446_v4, %v1445_v55  ;;  %v1592_v58 = vor.u32 %v1591_v18, %v1590_v5  ;;  %v1598_v45 = vor.u32 %v1597_v16, %v1596_v56 }
 0x178   :  { %v1600_v11 = vshrl.u32 %v2069_v48, %v1585_v22  ;;  %v1450_v57 = vsel %vm3239_vm11, %v2115_v60, %v1447_v8  ;;  %v3274_v37 = vsub.s32 %v1526_v3, %v1529_v43  ;;  %v1595_v49 = vor.u32 %v1594_v17, %v1593_v59 }
 0x179   :  { %vm1605_vm13 = vcmp.lt.s32.totalorder %v1583_v42, 4  ;;  %1999 = vcosq.f32 %v1450_v57  ;;  %vm1604_vm14 = vcmp.lt.s32.totalorder %v1583_v42, 3  ;;  %vm1603_vm0 = vcmp.lt.s32.totalorder %v1583_v42, 2 }
 0x17a   :  { %v1601_v10 = vor.u32 %v1600_v11, %v1599_v44  ;;  %2001 = vsinq.f32 %v1450_v57  ;;  %v1532_v30 = vsub.s32 0, %v3274_v37  ;;  %v1607_v20 = vsel %vm1605_vm13, %v1595_v49, 2102212464 }
 0x17b   :  { %v1610_v50 = vsel %vm1602_vm12, %v1589_v31, %v1592_v58  ;;  %v1611_v51 = vsel %vm1605_vm13, %v1598_v45, 920167782  ;;  %v1618_v29 = vshll.u32 %v1578_v33, 8  ;;  %v1677_v47 = vand.u32 2139095040, %v2121_v63 }
 0x17c   :  { %v1456_v25 = vand.u32 3, %v1455_v15  ;;  %v1866_v41 = vmin.u32 %v1532_v30, %v3274_v37  ;;  %v1606_v2 = vsel %vm1602_vm12, %v1586_v52, %v1589_v31  ;;  %v1612_v23 = vsel %vm1604_vm14, %v1595_v49, %v1611_v51 }
 0x17d   :  { %v1608_v1 = vsel %vm1604_vm14, %v1592_v58, %v1607_v20  ;;  %v1613_v13 = vsel %vm1603_vm0, %v1610_v50, %v1612_v23  ;;  %v1614_v26 = vsel %vm1602_vm12, %v1592_v58, %v1595_v49  ;;  %v1615_v28 = vsel %vm1605_vm13, %v1601_v10, 1326507024 }
 0x17e   :  { %vm1454_vm1 = vweird.f32 %v2115_v60  ;;  %v1534_v6 = vclz %v1866_v41  ;;  %v1616_v35 = vsel %vm1604_vm14, %v1598_v45, %v1615_v28  ;;  %v1678_v21 = vshrl.u32 %v1677_v47, 23 }
 0x17f   :  { %v3290_v9 = vmul.u32.u64.low %v1618_v29, %v1613_v13  ;;  %v3291_v3 = vmul.u32.u64.high %v1618_v29, %v1613_v13, %v3290_v9  ;;  %vm1457_vm15 = vcmp.lt.s32.totalorder %v1456_v25, 2  ;;  %v1609_v19 = vsel %vm1603_vm0, %v1606_v2, %v1608_v1 }
 0x180   :  { %v1867_v14 = vadd.s32 4294967294, %v1534_v6  ;;  %v1617_v33 = vsel %vm1603_vm0, %v1614_v26, %v1616_v35  ;;  %vm1458_vm2 = vcmp.eq.s32.totalorder %v1456_v25, 0  ;;  %v1873_v22 = vadd.s32 4294967169, %v1678_v21 }
 0x181   :  { %v3296_v0 = vmul.u32.u64.low %v1618_v29, %v1617_v33  ;;  %v3297_v27 = vmul.u32.u64.high %v1618_v29, %v1617_v33, %v3296_v0  ;;  %vm1461_vm3 = vcmp.eq.s32.totalorder %v1456_v25, 2  ;;  %v1522_v7 = vadd.s32 %v3215_v12, %v3224_v39 }
 0x182   :  { %vm1868_vm5 = vcmp.lt.s32.totalorder %v1867_v14, 0  ;;  %v1674_v55 = vand.u32 2147483647, %v2121_v63  ;;  %v1625_v56 = vmul.u32 %v1618_v29, %v1609_v19  ;;  %v1628_v46 = vadd.s32 1, %v3291_v3 }
 0x183   :  { %v2000_v15 = vpop.eup %1999  ;;  %v1537_v5 = vsel %vm1868_vm5, 0, %v1867_v14  ;;  %v1684_v18 = vadd.s32 1, %v1873_v22  ;;  %v1552_v43 = vsub.s32 4, %v3258_v53  ;;  %vm1627_vm6 = vc.u32 %v3297_v27, %v3290_v9 }
 0x184   :  { %v2002_v42 = vpop.eup %2001  ;;  %v1462_v59 = vxor.u32 2147483648, %v2000_v15  ;;  %v1538_v4 = vsub.s32 32, %v1537_v5  ;;  %v1539_v17 = vshll.u32 %v3274_v37, %v1537_v5  ;;  %v1542_v16 = vsub.s32 4294967266, %v1537_v5 }
 0x185   :  { %v1459_v44 = vxor.u32 2147483648, %v2002_v42  ;;  %vm1685_vm4 = vcmp.gt.s32.totalorder %v1684_v18, 0  ;;  %v1629_v31 = vsel %vm1627_vm6, %v1628_v46, %v3291_v3  ;;  %v1681_v45 = vand.u32 8388607, %v1674_v55 }
 0x186   :  { %v1463_v12 = vsel %vm1461_vm3, %v1462_v59, %v2002_v42  ;;  %v1540_v39 = vshrl.u32 %v1522_v7, %v1538_v4  ;;  %v1543_v52 = vadd.s32 127, %v1542_v16  ;;  %v1630_v58 = vadd.s32 %v1629_v31, %v1625_v56 }
 0x187   :  { %v1460_v8 = vsel %vm1458_vm2, %v2000_v15, %v1459_v44  ;;  %v1686_v11 = vsel %vm1685_vm4, %v1684_v18, 0  ;;  %vm1468_vm7 = vcmp.lt.s32.totalorder %v2117_v61, 0  ;;  %vm3318_vm8 = vcmp.le.f32.partialorder %v1466_v24, 0.7853982 }
 0x188   :  { %v1464_v57 = vsel %vm1457_vm15, %v1460_v8, %v1463_v12  ;;  %v1541_v37 = vor.u32 %v1540_v39, %v1539_v17  ;;  %v1544_v49 = vshll.u32 %v1543_v52, 23  ;;  %v1631_v30 = vadd.s32 536870912, %v1630_v58 }
 0x189   :  { %v1465_v10 = vsel %vm1454_vm1, nan, %v1464_v57  ;;  %v1688_v20 = vand.u32 31, %v1686_v11  ;;  %v1553_v47 = vsel %vm1468_vm7, %v1552_v43, %v3258_v53  ;;  %v1682_v60 = vor.u32 8388608, %v1681_v45 }
 0x18a   :  { %v1545_v51 = vor.u32 4788187, %v1544_v49  ;;  %v1548_v29 = vcvt.s32.f32 %v1541_v37  ;;  %1790 = vst [vmem:[#allocation5 + $0x60] sm:$0xff] %v1465_v10  ;;  %v3325_v25 = vshrl.u32 %v1631_v30, 30  ;;  %v1687_v41 = vshrl.u32 %v1686_v11, 5 }
 0x18b   :  { %v1689_v2 = vsub.s32 32, %v1688_v20  ;;  %v1691_v1 = vshll.u32 %v2064_v32, %v1688_v20  ;;  %v1694_v24 = vshll.u32 %v2065_v34, %v1688_v20  ;;  %v1697_v13 = vshll.u32 %v2066_v36, %v1688_v20 }
 0x18c   :  { %v1546_v23 = vand.u32 2147483647, %v1545_v51  ;;  %v1633_v26 = vshll.u32 %v3325_v25, 30  ;;  %v1700_v6 = vshll.u32 %v2067_v38, %v1688_v20  ;;  %v1703_v53 = vshll.u32 %v2068_v40, %v1688_v20 }
 0x18d   :  { %v1692_v28 = vshrl.u32 %v2065_v34, %v1689_v2  ;;  %v1695_v3 = vshrl.u32 %v2066_v36, %v1689_v2  ;;  %v1698_v21 = vshrl.u32 %v2067_v38, %v1689_v2  ;;  %v1701_v14 = vshrl.u32 %v2068_v40, %v1689_v2 }
 0x18e   :  { %v1549_v35 = vmul.f32 %v1548_v29, %v1546_v23  ;;  %v1555_v19 = vsel %vm3318_vm8, 0, %v1553_v47  ;;  %v1634_v33 = vsub.s32 %v1630_v58, %v1633_v26  ;;  %v1704_v0 = vshrl.u32 %v2069_v48, %v1689_v2 }
 0x18f   :  { %v1693_v7 = vor.u32 %v1692_v28, %v1691_v1  ;;  %v1696_v34 = vor.u32 %v1695_v3, %v1694_v24  ;;  %v1722_v15 = vshll.u32 %v1682_v60, 8  ;;  %v1699_v56 = vor.u32 %v1698_v21, %v1697_v13 }
 0x190   :  { %v1550_v22 = vxor.u32 2147483648, %v1549_v35  ;;  %v1636_v5 = vsub.s32 0, %v1634_v33  ;;  %v1702_v46 = vor.u32 %v1701_v14, %v1700_v6  ;;  %vm1706_vm9 = vcmp.lt.s32.totalorder %v1687_v41, 1 }
 0x191   :  { %v1690_v38 = vshrl.u32 %v2064_v32, %v1689_v2  ;;  %v1705_v40 = vor.u32 %v1704_v0, %v1703_v53  ;;  %vm1709_vm11 = vcmp.lt.s32.totalorder %v1687_v41, 4  ;;  %vm1708_vm10 = vcmp.lt.s32.totalorder %v1687_v41, 3 }
 0x192   :  { %v1551_v36 = vsel %vm1468_vm7, %v1550_v22, %v1549_v35  ;;  %v1870_v48 = vmin.u32 %v1636_v5, %v1634_v33  ;;  %v1711_v42 = vsel %vm1709_vm11, %v1699_v56, 2102212464  ;;  %vm1707_vm12 = vcmp.lt.s32.totalorder %v1687_v41, 2 }
 0x193   :  { %v1554_v18 = vsel %vm3318_vm8, %v2117_v61, %v1551_v36  ;;  %v1714_v59 = vsel %vm1706_vm9, %v1693_v7, %v1696_v34  ;;  %v1715_v4 = vsel %vm1709_vm11, %v1702_v46, 920167782  ;;  %v1559_v17 = vadd.s32 3, %v1555_v19 }
 0x194   :  { %2003 = vcosq.f32 %v1554_v18  ;;  %v1638_v16 = vclz %v1870_v48  ;;  %v1710_v32 = vsel %vm1706_vm9, %v1690_v38, %v1693_v7  ;;  %v1712_v44 = vsel %vm1708_vm10, %v1696_v34, %v1711_v42 }
 0x195   :  { %2005 = vsinq.f32 %v1554_v18  ;;  %v1716_v43 = vsel %vm1708_vm10, %v1699_v56, %v1715_v4  ;;  %v1718_v12 = vsel %vm1706_vm9, %v1696_v34, %v1699_v56  ;;  %v1719_v31 = vsel %vm1709_vm11, %v1705_v40, 1326507024 }
 0x196   :  { %v1871_v39 = vadd.s32 4294967294, %v1638_v16  ;;  %v1717_v52 = vsel %vm1707_vm12, %v1714_v59, %v1716_v43  ;;  %v1720_v8 = vsel %vm1708_vm10, %v1702_v46, %v1719_v31  ;;  %v1626_v11 = vadd.s32 %v3290_v9, %v3297_v27 }
 0x197   :  { %v3356_v58 = vmul.u32.u64.low %v1722_v15, %v1717_v52  ;;  %v3357_v45 = vmul.u32.u64.high %v1722_v15, %v1717_v52, %v3356_v58  ;;  %v1713_v57 = vsel %vm1707_vm12, %v1710_v32, %v1712_v44  ;;  %v1721_v37 = vsel %vm1707_vm12, %v1718_v12, %v1720_v8 }
 0x198   :  { %vm1872_vm13 = vcmp.lt.s32.totalorder %v1871_v39, 0  ;;  %v1560_v49 = vand.u32 3, %v1559_v17  ;;  %v3363_v30 = vmul.u32.u64.low %v1722_v15, %v1721_v37  ;;  %v3364_v20 = vmul.u32.u64.high %v1722_v15, %v1721_v37, %v3363_v30 }
 0x199   :  { %v1641_v10 = vsel %vm1872_vm13, 0, %v1871_v39  ;;  %v1729_v47 = vmul.u32 %v1722_v15, %v1713_v57  ;;  %v1732_v60 = vadd.s32 1, %v3357_v45  ;;  %vm1558_vm2 = vweird.f32 %v2117_v61 }
 0x19a   :  { %v1642_v50 = vsub.s32 32, %v1641_v10  ;;  %v1643_v51 = vshll.u32 %v1634_v33, %v1641_v10  ;;  %v1646_v29 = vsub.s32 4294967266, %v1641_v10  ;;  %vm1562_vm14 = vcmp.eq.s32.totalorder %v1560_v49, 0 }
 0x19b   :  { %vm1565_vm0 = vcmp.eq.s32.totalorder %v1560_v49, 2  ;;  %vm1731_vm1 = vc.u32 %v3364_v20, %v3356_v58  ;;  %vm1561_vm15 = vcmp.lt.s32.totalorder %v1560_v49, 2  ;;  %v1656_v33 = vsub.s32 4, %v3325_v25 }
 0x19c   :  { %v1644_v2 = vshrl.u32 %v1626_v11, %v1642_v50  ;;  %v1647_v23 = vadd.s32 127, %v1646_v29  ;;  %v1733_v13 = vsel %vm1731_vm1, %v1732_v60, %v3357_v45  ;;  %vm1572_vm3 = vcmp.lt.s32.totalorder %v2119_v62, 0 }
 0x19d   :  { %v1734_v28 = vadd.s32 %v1733_v13, %v1729_v47  ;;  %vm1571_vm5 = vcmp.le.f32.partialorder %v1570_v54, 0.7853982  ;;  %v1657_v15 = vsel %vm1572_vm3, %v1656_v33, %v3325_v25  ;;  %v1730_v4 = vadd.s32 %v3356_v58, %v3364_v20 }
 0x19e   :  { %v2004_v1 = vpop.eup %2003  ;;  %v1645_v41 = vor.u32 %v1644_v2, %v1643_v51  ;;  %v1648_v24 = vshll.u32 %v1647_v23, 23  ;;  %v1659_v36 = vsel %vm1571_vm5, 0, %v1657_v15  ;;  %vm1662_vm9 = vweird.f32 %v2119_v62 }
 0x19f   :  { %v2006_v9 = vpop.eup %2005  ;;  %v1566_v27 = vxor.u32 2147483648, %v2004_v1  ;;  %v1735_v21 = vadd.s32 536870912, %v1734_v28  ;;  %v1663_v18 = vadd.s32 3, %v1659_v36  ;;  %vm1676_vm11 = vcmp.lt.s32.totalorder %v2121_v63, 0 }
 0x1a0   :  { %v1563_v26 = vxor.u32 2147483648, %v2006_v9  ;;  %v1649_v53 = vor.u32 4788187, %v1648_v24  ;;  %v1652_v35 = vcvt.s32.f32 %v1645_v41  ;;  %vm1675_vm10 = vcmp.le.f32.partialorder %v1674_v55, 0.7853982 }
 0x1a1   :  { %v1567_v6 = vsel %vm1565_vm0, %v1566_v27, %v2006_v9  ;;  %v1736_v22 = vshrl.u32 %v1735_v21, 30  ;;  %v1664_v59 = vand.u32 3, %v1663_v18  ;;  %vm1766_vm0 = vweird.f32 %v2121_v63 }
 0x1a2   :  { %v1564_v3 = vsel %vm1562_vm14, %v2004_v1, %v1563_v26  ;;  %v1650_v19 = vand.u32 2147483647, %v1649_v53 }
 0x1a3   :  { %v1568_v14 = vsel %vm1561_vm15, %v1564_v3, %v1567_v6  ;;  %v1737_v34 = vshll.u32 %v1736_v22, 30  ;;  %vm1669_vm4 = vcmp.eq.s32.totalorder %v1664_v59, 2  ;;  %vm1666_vm7 = vcmp.eq.s32.totalorder %v1664_v59, 0 }
 0x1a4   :  { %v1569_v0 = vsel %vm1558_vm2, nan, %v1568_v14  ;;  %v1653_v7 = vmul.f32 %v1652_v35, %v1650_v19  ;;  %vm1665_vm8 = vcmp.lt.s32.totalorder %v1664_v59, 2  ;;  %v1760_v30 = vsub.s32 4, %v1736_v22 }
 0x1a5   :  { %1791 = vst [vmem:[#allocation5 + $0x68] sm:$0xff] %v1569_v0  ;;  %v1738_v5 = vsub.s32 %v1734_v28, %v1737_v34 }
 0x1a6   :  { %v1654_v61 = vxor.u32 2147483648, %v1653_v7  ;;  %v1761_v51 = vsel %vm1676_vm11, %v1760_v30, %v1736_v22 }
 0x1a7   :  { %v1740_v38 = vsub.s32 0, %v1738_v5  ;;  %v1763_v47 = vsel %vm1675_vm10, 0, %v1761_v51 }
 0x1a8   :  { %v1655_v56 = vsel %vm1572_vm3, %v1654_v61, %v1653_v7  ;;  %v1767_v60 = vadd.s32 3, %v1763_v47 }
 0x1a9   :  { %v1658_v46 = vsel %vm1571_vm5, %v2119_v62, %v1655_v56  ;;  %v1874_v40 = vmin.u32 %v1740_v38, %v1738_v5 }
 0x1aa   :  { %2007 = vcosq.f32 %v1658_v46  ;;  %v1768_v2 = vand.u32 3, %v1767_v60 }
 0x1ab   :  { %2009 = vsinq.f32 %v1658_v46  ;;  %v1742_v48 = vclz %v1874_v40 }
 0x1ac   :  { %vm1773_vm12 = vcmp.eq.s32.totalorder %v1768_v2, 2  ;;  %vm1770_vm13 = vcmp.eq.s32.totalorder %v1768_v2, 0  ;;  %vm1769_vm14 = vcmp.lt.s32.totalorder %v1768_v2, 2 }
 0x1ad   :  { %v1875_v42 = vadd.s32 4294967294, %v1742_v48 }
 0x1af   :  { %vm1876_vm6 = vcmp.lt.s32.totalorder %v1875_v42, 0 }
 0x1b0   :  { %v1745_v54 = vsel %vm1876_vm6, 0, %v1875_v42 }
 0x1b1   :  { %v1746_v17 = vsub.s32 32, %v1745_v54  ;;  %v1747_v16 = vshll.u32 %v1738_v5, %v1745_v54  ;;  %v1750_v25 = vsub.s32 4294967266, %v1745_v54 }
 0x1b3   :  { %v1748_v12 = vshrl.u32 %v1730_v4, %v1746_v17  ;;  %v1751_v39 = vadd.s32 127, %v1750_v25 }
 0x1b4   :  { %v2008_v32 = vpop.eup %2007 }
 0x1b5   :  { %v2010_v44 = vpop.eup %2009  ;;  %v1670_v43 = vxor.u32 2147483648, %v2008_v32  ;;  %v1749_v8 = vor.u32 %v1748_v12, %v1747_v16  ;;  %v1752_v45 = vshll.u32 %v1751_v39, 23 }
 0x1b6   :  { %v1667_v52 = vxor.u32 2147483648, %v2010_v44 }
 0x1b7   :  { %v1671_v31 = vsel %vm1669_vm4, %v1670_v43, %v2010_v44  ;;  %v1753_v57 = vor.u32 4788187, %v1752_v45  ;;  %v1756_v37 = vcvt.s32.f32 %v1749_v8 }
 0x1b8   :  { %v1668_v58 = vsel %vm1666_vm7, %v2008_v32, %v1667_v52 }
 0x1b9   :  { %v1672_v11 = vsel %vm1665_vm8, %v1668_v58, %v1671_v31  ;;  %v1754_v10 = vand.u32 2147483647, %v1753_v57 }
 0x1ba   :  { %v1673_v49 = vsel %vm1662_vm9, nan, %v1672_v11 }
 0x1bb   :  { %1792 = vst [vmem:[#allocation5 + $0x70] sm:$0xff] %v1673_v49  ;;  %v1757_v20 = vmul.f32 %v1756_v37, %v1754_v10 }
 0x1bd   :  { %v1758_v50 = vxor.u32 2147483648, %v1757_v20 }
 0x1bf   :  { %v1759_v62 = vsel %vm1676_vm11, %v1758_v50, %v1757_v20 }
 0x1c0   :  { %v1762_v29 = vsel %vm1675_vm10, %v2121_v63, %v1759_v62 }
 0x1c1   :  { %2011 = vcosq.f32 %v1762_v29 }
 0x1c2   :  { %2013 = vsinq.f32 %v1762_v29 }
 0x1cb   :  { %v2012_v23 = vpop.eup %2011 }
 0x1cc   :  { %v2014_v1 = vpop.eup %2013  ;;  %v1774_v9 = vxor.u32 2147483648, %v2012_v23 }
 0x1cd   :  { %v1771_v27 = vxor.u32 2147483648, %v2014_v1 }
 0x1ce   :  { %v1775_v55 = vsel %vm1773_vm12, %v1774_v9, %v2014_v1 }
 0x1cf   :  { %v1772_v41 = vsel %vm1770_vm13, %v2012_v23, %v1771_v27 }
 0x1d0   :  { %v1776_v24 = vsel %vm1769_vm14, %v1772_v41, %v1775_v55 }
 0x1d1   :  { %v1777_v13 = vsel %vm1766_vm0, nan, %v1776_v24 }
 0x1d2   :  { %1793 = vst [vmem:[#allocation5 + $0x78] sm:$0xff] %v1777_v13 }
 0x1d3   :  { %2048 = shalt.err (!%p2045_p12)
}
 0x1d4   :  { %s2049_s22 = scalar_lea.hbm %s3396_s1, 2048 }
 0x1d5   :  { %p2050_p13 = scmp.ne.s32.totalorder %s3396_s1, %s2049_s22  ;;  %p2053_p0 = scmp.lt.u32.totalorder %s2049_s22, %s3396_s1 }
 0x1d7   :  { %p2055_p1 = pnand %p2053_p0, %p2050_p13 }
 0x1d9   :  { %2058 = shalt.err (!%p2055_p1)
}
 0x1da   :  { %s2071_s27 = smov 128   ;;  %s2072_s28 = smov 8  }
 0x1db   :  { %1805 = dma.vmem_to_hbm [thread:$0]  %s1800_s18, 2048, %s3396_s1, [#allocation4], %s2071_s27, %s2071_s27, %s2072_s28  }
 0x1dc   :  { %2061 = dma.done.wait [#allocation4], 2048  }
 0x1dd   :  { %2062 = vsyncadd [#allocation4], 4294965248 }
 0x1de   :  { %1809 = vsyncpa [#allocation3], 1 }
 0x1df   :  { %1810 = vsyncpa [#allocation4], 1 }

</bundles_post_ra>
